<compile_context>
chip_gen: v7x
topology: tpu7x:2x2x1
jax: 0.10.0
libtpu: 0.0.40
codegen_flags: <defaults>
</compile_context>

<pallas_src>
import math
import functools

import jax
import jax.numpy as jnp
from jax.experimental import pallas as pl
from jax.experimental.pallas import tpu as pltpu


def _cross_attn_kernel(img_ref, feat_ref,
                       wq_ref, wk_ref, wv_ref, bq_ref, bk_ref, bv_ref,
                       wo_ref, bo_ref,
                       w1_ref, b1_ref, w2_ref, b2_ref,
                       g1_ref, be1_ref, g2_ref, be2_ref,
                       out_ref, *, n_head, lq, lk, b_tile):
    # img_ref:  (B_TILE*Lq, E) f32, batch-major rows (rows of one batch are contiguous)
    # feat_ref: (B_TILE*Lk, E) f32
    x = img_ref[...]                       # f32, kept for residuals / LayerNorm
    kv = feat_ref[...]

    e = x.shape[-1]
    dh = e // n_head

    xb = x.astype(jnp.bfloat16)
    kvb = kv.astype(jnp.bfloat16)

    # Load weights (already bf16) and biases (f32) once.
    wq = wq_ref[...]; wk = wk_ref[...]; wv = wv_ref[...]; wo = wo_ref[...]
    bq = bq_ref[...]; bk = bk_ref[...]; bv = bv_ref[...]; bo = bo_ref[...]
    w1 = w1_ref[...]; b1 = b1_ref[...]; w2 = w2_ref[...]; b2 = b2_ref[...]
    g1 = g1_ref[...]; be1 = be1_ref[...]; g2 = g2_ref[...]; be2 = be2_ref[...]

    # --- in-projections (bf16 matmul, f32 accumulate).  1/sqrt(dh) is already
    #     folded into wq/bq by the wrapper. ---
    q = jnp.dot(xb, wq, preferred_element_type=jnp.float32) + bq      # (Rq, E)
    k = jnp.dot(kvb, wk, preferred_element_type=jnp.float32) + bk     # (Rk, E)
    v = jnp.dot(kvb, wv, preferred_element_type=jnp.float32) + bv     # (Rk, E)

    qb = q.astype(jnp.bfloat16)
    kb = k.astype(jnp.bfloat16)
    vb = v.astype(jnp.bfloat16)

    dn_nt = (((1,), (1,)), ((), ()))   # contract last dims: q @ k^T without a transpose op
    dn_nn = (((1,), (0,)), ((), ()))   # plain matmul

    # --- attention + output projection, per (batch, head); output projection is
    #     applied per-head and summed (== concat(heads) @ Wo), so no concatenate
    #     along the lane axis is needed. ---
    attn_rows = []
    for b in range(b_tile):
        q_b = qb[b * lq:(b + 1) * lq, :]               # (Lq, E)
        k_b = kb[b * lk:(b + 1) * lk, :]               # (Lk, E)
        v_b = vb[b * lk:(b + 1) * lk, :]               # (Lk, E)
        acc = None                                     # (Lq, E) f32
        for h in range(n_head):
            qh = q_b[:, h * dh:(h + 1) * dh]           # (Lq, dh)
            kh = k_b[:, h * dh:(h + 1) * dh]           # (Lk, dh)
            vh = v_b[:, h * dh:(h + 1) * dh]           # (Lk, dh)
            s = jax.lax.dot_general(qh, kh, dn_nt,
                                    preferred_element_type=jnp.float32)   # (Lq, Lk)
            s = s - jnp.max(s, axis=-1, keepdims=True)
            p = jnp.exp(s)
            inv = pl.reciprocal(jnp.sum(p, axis=-1, keepdims=True), approx=True)
            p = p * inv
            ctx = jax.lax.dot_general(p.astype(jnp.bfloat16), vh, dn_nn,
                                      preferred_element_type=jnp.float32)  # (Lq, dh)
            contrib = jax.lax.dot_general(ctx.astype(jnp.bfloat16),
                                          wo[h * dh:(h + 1) * dh, :], dn_nn,
                                          preferred_element_type=jnp.float32)  # (Lq, E)
            acc = contrib if acc is None else acc + contrib
        attn_rows.append(acc)
    attn = attn_rows[0] if b_tile == 1 else jnp.concatenate(attn_rows, axis=0)
    attn = attn + bo                                   # (Rq, E)

    # --- residual + LayerNorm 1 (dropout1 = identity in eval), f32 stats ---
    y = x + attn
    mu = jnp.mean(y, axis=-1, keepdims=True)
    var = jnp.mean(jnp.square(y - mu), axis=-1, keepdims=True)
    y = (y - mu) * jax.lax.rsqrt(var + 1e-5) * g1 + be1

    # --- feed-forward: linear1 -> relu -> linear2 (dropout = identity) ---
    h1 = jnp.dot(y.astype(jnp.bfloat16), w1, preferred_element_type=jnp.float32) + b1
    h1 = jnp.maximum(h1, 0.0)
    ff = jnp.dot(h1.astype(jnp.bfloat16), w2, preferred_element_type=jnp.float32) + b2

    # --- residual + LayerNorm 2 (dropout2 = identity) ---
    z = y + ff
    mu2 = jnp.mean(z, axis=-1, keepdims=True)
    var2 = jnp.mean(jnp.square(z - mu2), axis=-1, keepdims=True)
    out_ref[...] = (z - mu2) * jax.lax.rsqrt(var2 + 1e-5) * g2 + be2


def cross_attention(image, feature, params, *, n_head, b_tile=None):
    """image: (Lq, N, E), feature: (Lk, N, E) -- PyTorch MHA (seq, batch, embed) layout."""
    lq, n, e = image.shape
    lk = feature.shape[0]
    f = params["w1"].shape[1]
    assert e % n_head == 0
    dh = e // n_head

    # Batch elements processed per grid step: big enough to fill sublanes and
    # amortize the ~0.35us per-step overhead.  (For v7x megacore, pick b_tile
    # so the grid has >=2 "parallel" steps when there is enough batch.)
    if b_tile is None:
        b_tile = min(n, max(1, 128 // max(lq, 1)))
        while n % b_tile:
            b_tile -= 1
    assert n % b_tile == 0
    grid_n = n // b_tile
    rq = b_tile * lq
    rk = b_tile * lk

    # Pack to batch-major 2-D row slabs (rows of one batch element contiguous).
    img_rows = jnp.transpose(image, (1, 0, 2)).reshape(n * lq, e)
    feat_rows = jnp.transpose(feature, (1, 0, 2)).reshape(n * lk, e)

    # Fold the attention scale into Wq/bq; ship weights in bf16 (f32 accumulate
    # happens inside the kernel), biases / LN params in f32.
    scale = 1.0 / math.sqrt(dh)
    bf16 = jnp.bfloat16
    wq = (params["wq"] * scale).astype(bf16)
    bq = params["bq"] * scale
    wk = params["wk"].astype(bf16)
    wv = params["wv"].astype(bf16)
    wo = params["wo"].astype(bf16)
    w1 = params["w1"].astype(bf16)
    w2 = params["w2"].astype(bf16)

    full = lambda shape: pl.BlockSpec(shape, lambda b: (0, 0))

    kernel = functools.partial(_cross_attn_kernel, n_head=n_head,
                               lq=lq, lk=lk, b_tile=b_tile)

    out_rows = pl.pallas_call(
        kernel,
        out_shape=jax.ShapeDtypeStruct((n * lq, e), jnp.float32),
        grid=(grid_n,),
        in_specs=[
            pl.BlockSpec((rq, e), lambda b: (b, 0)),    # image rows (batch tile)
            pl.BlockSpec((rk, e), lambda b: (b, 0)),    # feature rows (same batch tile)
            full((e, e)), full((e, e)), full((e, e)),   # wq, wk, wv   (bf16)
            full((1, e)), full((1, e)), full((1, e)),   # bq, bk, bv   (f32)
            full((e, e)), full((1, e)),                 # wo (bf16), bo
            full((e, f)), full((1, f)),                 # w1 (bf16), b1
            full((f, e)), full((1, e)),                 # w2 (bf16), b2
            full((1, e)), full((1, e)),                 # ln1 gamma, beta
            full((1, e)), full((1, e)),                 # ln2 gamma, beta
        ],
        out_specs=pl.BlockSpec((rq, e), lambda b: (b, 0)),
        compiler_params=pltpu.CompilerParams(
            dimension_semantics=("parallel",),
            vmem_limit_bytes=32 * 1024 * 1024),
    )(img_rows, feat_rows,
      wq, wk, wv, bq, params["bk"], params["bv"],
      wo, params["bo"],
      w1, params["b1"], w2, params["b2"],
      params["g1"], params["be1"], params["g2"], params["be2"])

    # Back to PyTorch (seq, batch, embed) layout.
    return jnp.transpose(out_rows.reshape(n, lq, e), (1, 0, 2))


def init_params(key, d_model, dim_feedforward):
    ks = jax.random.split(key, 8)
    s = 0.02
    # Weights stored pre-transposed as (in, out) so the kernel computes x @ W.
    return {
        "wq": s * jax.random.normal(ks[0], (d_model, d_model), jnp.float32),
        "wk": s * jax.random.normal(ks[1], (d_model, d_model), jnp.float32),
        "wv": s * jax.random.normal(ks[2], (d_model, d_model), jnp.float32),
        "bq": jnp.zeros((1, d_model), jnp.float32),
        "bk": jnp.zeros((1, d_model), jnp.float32),
        "bv": jnp.zeros((1, d_model), jnp.float32),
        "wo": s * jax.random.normal(ks[3], (d_model, d_model), jnp.float32),
        "bo": jnp.zeros((1, d_model), jnp.float32),
        "w1": s * jax.random.normal(ks[4], (d_model, dim_feedforward), jnp.float32),
        "b1": jnp.zeros((1, dim_feedforward), jnp.float32),
        "w2": s * jax.random.normal(ks[5], (dim_feedforward, d_model), jnp.float32),
        "b2": jnp.zeros((1, d_model), jnp.float32),
        "g1": jnp.ones((1, d_model), jnp.float32),
        "be1": jnp.zeros((1, d_model), jnp.float32),
        "g2": jnp.ones((1, d_model), jnp.float32),
        "be2": jnp.zeros((1, d_model), jnp.float32),
    }


if __name__ == "__main__":
    d_model = 32
    n_head = 4
    dim_feedforward = 64
    lq, lk, batch = 8, 8, 2

    key = jax.random.PRNGKey(0)
    k_img, k_feat, k_par = jax.random.split(key, 3)

    image = jax.random.normal(k_img, (lq, batch, d_model), jnp.float32)
    feature = jax.random.normal(k_feat, (lk, batch, d_model), jnp.float32)
    params = init_params(k_par, d_model, dim_feedforward)

    out = cross_attention(image, feature, params, n_head=n_head)
    jax.block_until_ready(out)
    assert out.shape == (lq, batch, d_model)
    print("KERNEL_OK")
</pallas_src>

<mosaic_0001>
module attributes {stable_mosaic.version = 11 : i64} {
  func.func @_cross_attn_kernel(%arg0: i32, %arg1: memref<16x32xf32, #tpu.memory_space<vmem>>, %arg2: memref<16x32xf32, #tpu.memory_space<vmem>>, %arg3: memref<32x32xbf16, #tpu.memory_space<vmem>>, %arg4: memref<32x32xbf16, #tpu.memory_space<vmem>>, %arg5: memref<32x32xbf16, #tpu.memory_space<vmem>>, %arg6: memref<1x32xf32, #tpu.memory_space<vmem>>, %arg7: memref<1x32xf32, #tpu.memory_space<vmem>>, %arg8: memref<1x32xf32, #tpu.memory_space<vmem>>, %arg9: memref<32x32xbf16, #tpu.memory_space<vmem>>, %arg10: memref<1x32xf32, #tpu.memory_space<vmem>>, %arg11: memref<32x64xbf16, #tpu.memory_space<vmem>>, %arg12: memref<1x64xf32, #tpu.memory_space<vmem>>, %arg13: memref<64x32xbf16, #tpu.memory_space<vmem>>, %arg14: memref<1x32xf32, #tpu.memory_space<vmem>>, %arg15: memref<1x32xf32, #tpu.memory_space<vmem>>, %arg16: memref<1x32xf32, #tpu.memory_space<vmem>>, %arg17: memref<1x32xf32, #tpu.memory_space<vmem>>, %arg18: memref<1x32xf32, #tpu.memory_space<vmem>>, %arg19: memref<16x32xf32, #tpu.memory_space<vmem>>) attributes {dimension_semantics = [#tpu.dimension_semantics<parallel>], iteration_bounds = array<i64: 1>, scalar_prefetch = 0 : i64, scratch_operands = 0 : i64, tpu.core_type = #tpu.core_type<tc>, window_params = [{transform_indices = @transform_0, window_bounds = array<i64: 16, 32>}, {transform_indices = @transform_1, window_bounds = array<i64: 16, 32>}, {pipeline_mode = #tpu.pipeline_mode<synchronous>, transform_indices = @transform_2, window_bounds = array<i64: 32, 32>}, {pipeline_mode = #tpu.pipeline_mode<synchronous>, transform_indices = @transform_3, window_bounds = array<i64: 32, 32>}, {pipeline_mode = #tpu.pipeline_mode<synchronous>, transform_indices = @transform_4, window_bounds = array<i64: 32, 32>}, {pipeline_mode = #tpu.pipeline_mode<synchronous>, transform_indices = @transform_5, window_bounds = array<i64: 1, 32>}, {pipeline_mode = #tpu.pipeline_mode<synchronous>, transform_indices = @transform_6, window_bounds = array<i64: 1, 32>}, {pipeline_mode = #tpu.pipeline_mode<synchronous>, transform_indices = @transform_7, window_bounds = array<i64: 1, 32>}, {pipeline_mode = #tpu.pipeline_mode<synchronous>, transform_indices = @transform_8, window_bounds = array<i64: 32, 32>}, {pipeline_mode = #tpu.pipeline_mode<synchronous>, transform_indices = @transform_9, window_bounds = array<i64: 1, 32>}, {pipeline_mode = #tpu.pipeline_mode<synchronous>, transform_indices = @transform_10, window_bounds = array<i64: 32, 64>}, {pipeline_mode = #tpu.pipeline_mode<synchronous>, transform_indices = @transform_11, window_bounds = array<i64: 1, 64>}, {pipeline_mode = #tpu.pipeline_mode<synchronous>, transform_indices = @transform_12, window_bounds = array<i64: 64, 32>}, {pipeline_mode = #tpu.pipeline_mode<synchronous>, transform_indices = @transform_13, window_bounds = array<i64: 1, 32>}, {pipeline_mode = #tpu.pipeline_mode<synchronous>, transform_indices = @transform_14, window_bounds = array<i64: 1, 32>}, {pipeline_mode = #tpu.pipeline_mode<synchronous>, transform_indices = @transform_15, window_bounds = array<i64: 1, 32>}, {pipeline_mode = #tpu.pipeline_mode<synchronous>, transform_indices = @transform_16, window_bounds = array<i64: 1, 32>}, {pipeline_mode = #tpu.pipeline_mode<synchronous>, transform_indices = @transform_17, window_bounds = array<i64: 1, 32>}, {transform_indices = @transform_18, window_bounds = array<i64: 16, 32>}]} {
    %c0 = arith.constant 0 : index
    %c0_0 = arith.constant 0 : index
    %0 = vector.load %arg1[%c0, %c0_0] : memref<16x32xf32, #tpu.memory_space<vmem>>, vector<16x32xf32>
    %c0_1 = arith.constant 0 : index
    %c0_2 = arith.constant 0 : index
    %1 = vector.load %arg2[%c0_1, %c0_2] : memref<16x32xf32, #tpu.memory_space<vmem>>, vector<16x32xf32>
    %2 = arith.truncf %0 : vector<16x32xf32> to vector<16x32xbf16>
    %3 = arith.truncf %1 : vector<16x32xf32> to vector<16x32xbf16>
    %c0_3 = arith.constant 0 : index
    %c0_4 = arith.constant 0 : index
    %4 = vector.load %arg3[%c0_3, %c0_4] : memref<32x32xbf16, #tpu.memory_space<vmem>>, vector<32x32xbf16>
    %c0_5 = arith.constant 0 : index
    %c0_6 = arith.constant 0 : index
    %5 = vector.load %arg4[%c0_5, %c0_6] : memref<32x32xbf16, #tpu.memory_space<vmem>>, vector<32x32xbf16>
    %c0_7 = arith.constant 0 : index
    %c0_8 = arith.constant 0 : index
    %6 = vector.load %arg5[%c0_7, %c0_8] : memref<32x32xbf16, #tpu.memory_space<vmem>>, vector<32x32xbf16>
    %c0_9 = arith.constant 0 : index
    %c0_10 = arith.constant 0 : index
    %7 = vector.load %arg9[%c0_9, %c0_10] : memref<32x32xbf16, #tpu.memory_space<vmem>>, vector<32x32xbf16>
    %c0_11 = arith.constant 0 : index
    %c0_12 = arith.constant 0 : index
    %8 = vector.load %arg6[%c0_11, %c0_12] : memref<1x32xf32, #tpu.memory_space<vmem>>, vector<1x32xf32>
    %c0_13 = arith.constant 0 : index
    %c0_14 = arith.constant 0 : index
    %9 = vector.load %arg7[%c0_13, %c0_14] : memref<1x32xf32, #tpu.memory_space<vmem>>, vector<1x32xf32>
    %c0_15 = arith.constant 0 : index
    %c0_16 = arith.constant 0 : index
    %10 = vector.load %arg8[%c0_15, %c0_16] : memref<1x32xf32, #tpu.memory_space<vmem>>, vector<1x32xf32>
    %c0_17 = arith.constant 0 : index
    %c0_18 = arith.constant 0 : index
    %11 = vector.load %arg10[%c0_17, %c0_18] : memref<1x32xf32, #tpu.memory_space<vmem>>, vector<1x32xf32>
    %c0_19 = arith.constant 0 : index
    %c0_20 = arith.constant 0 : index
    %12 = vector.load %arg11[%c0_19, %c0_20] : memref<32x64xbf16, #tpu.memory_space<vmem>>, vector<32x64xbf16>
    %c0_21 = arith.constant 0 : index
    %c0_22 = arith.constant 0 : index
    %13 = vector.load %arg12[%c0_21, %c0_22] : memref<1x64xf32, #tpu.memory_space<vmem>>, vector<1x64xf32>
    %c0_23 = arith.constant 0 : index
    %c0_24 = arith.constant 0 : index
    %14 = vector.load %arg13[%c0_23, %c0_24] : memref<64x32xbf16, #tpu.memory_space<vmem>>, vector<64x32xbf16>
    %c0_25 = arith.constant 0 : index
    %c0_26 = arith.constant 0 : index
    %15 = vector.load %arg14[%c0_25, %c0_26] : memref<1x32xf32, #tpu.memory_space<vmem>>, vector<1x32xf32>
    %c0_27 = arith.constant 0 : index
    %c0_28 = arith.constant 0 : index
    %16 = vector.load %arg15[%c0_27, %c0_28] : memref<1x32xf32, #tpu.memory_space<vmem>>, vector<1x32xf32>
    %c0_29 = arith.constant 0 : index
    %c0_30 = arith.constant 0 : index
    %17 = vector.load %arg16[%c0_29, %c0_30] : memref<1x32xf32, #tpu.memory_space<vmem>>, vector<1x32xf32>
    %c0_31 = arith.constant 0 : index
    %c0_32 = arith.constant 0 : index
    %18 = vector.load %arg17[%c0_31, %c0_32] : memref<1x32xf32, #tpu.memory_space<vmem>>, vector<1x32xf32>
    %c0_33 = arith.constant 0 : index
    %c0_34 = arith.constant 0 : index
    %19 = vector.load %arg18[%c0_33, %c0_34] : memref<1x32xf32, #tpu.memory_space<vmem>>, vector<1x32xf32>
    %cst = arith.constant dense<0.000000e+00> : vector<16x32xf32>
    %20 = tpu.matmul %2, %4, %cst {dimension_numbers = #tpu.dot_dimension_numbers<[1], [0], [0], [1], [0, 0, 1, 1], [], []>} : vector<16x32xbf16>, vector<32x32xbf16>, vector<16x32xf32> -> vector<16x32xf32>
    %21 = vector.broadcast %8 : vector<1x32xf32> to vector<16x32xf32>
    %22 = arith.addf %20, %21 : vector<16x32xf32>
    %cst_35 = arith.constant dense<0.000000e+00> : vector<16x32xf32>
    %23 = tpu.matmul %3, %5, %cst_35 {dimension_numbers = #tpu.dot_dimension_numbers<[1], [0], [0], [1], [0, 0, 1, 1], [], []>} : vector<16x32xbf16>, vector<32x32xbf16>, vector<16x32xf32> -> vector<16x32xf32>
    %24 = vector.broadcast %9 : vector<1x32xf32> to vector<16x32xf32>
    %25 = arith.addf %23, %24 : vector<16x32xf32>
    %cst_36 = arith.constant dense<0.000000e+00> : vector<16x32xf32>
    %26 = tpu.matmul %3, %6, %cst_36 {dimension_numbers = #tpu.dot_dimension_numbers<[1], [0], [0], [1], [0, 0, 1, 1], [], []>} : vector<16x32xbf16>, vector<32x32xbf16>, vector<16x32xf32> -> vector<16x32xf32>
    %27 = vector.broadcast %10 : vector<1x32xf32> to vector<16x32xf32>
    %28 = arith.addf %26, %27 : vector<16x32xf32>
    %29 = arith.truncf %22 : vector<16x32xf32> to vector<16x32xbf16>
    %30 = arith.truncf %25 : vector<16x32xf32> to vector<16x32xbf16>
    %31 = arith.truncf %28 : vector<16x32xf32> to vector<16x32xbf16>
    %32 = vector.extract_strided_slice %29 {offsets = [0, 0], sizes = [8, 32], strides = [1, 1]} : vector<16x32xbf16> to vector<8x32xbf16>
    %33 = vector.extract_strided_slice %30 {offsets = [0, 0], sizes = [8, 32], strides = [1, 1]} : vector<16x32xbf16> to vector<8x32xbf16>
    %34 = vector.extract_strided_slice %31 {offsets = [0, 0], sizes = [8, 32], strides = [1, 1]} : vector<16x32xbf16> to vector<8x32xbf16>
    %35 = vector.extract_strided_slice %32 {offsets = [0, 0], sizes = [8, 8], strides = [1, 1]} : vector<8x32xbf16> to vector<8x8xbf16>
    %36 = vector.extract_strided_slice %33 {offsets = [0, 0], sizes = [8, 8], strides = [1, 1]} : vector<8x32xbf16> to vector<8x8xbf16>
    %37 = vector.extract_strided_slice %34 {offsets = [0, 0], sizes = [8, 8], strides = [1, 1]} : vector<8x32xbf16> to vector<8x8xbf16>
    %cst_37 = arith.constant dense<0.000000e+00> : vector<8x8xf32>
    %38 = tpu.matmul %35, %36, %cst_37 {dimension_numbers = #tpu.dot_dimension_numbers<[1], [1], [0], [0], [0, 0, 1, 0], [], []>} : vector<8x8xbf16>, vector<8x8xbf16>, vector<8x8xf32> -> vector<8x8xf32>
    %cst_38 = arith.constant dense<0xFF800000> : vector<8xf32>
    %39 = vector.multi_reduction <maximumf>, %38, %cst_38 [1] : vector<8x8xf32> to vector<8xf32>
    %40 = vector.shape_cast %39 : vector<8xf32> to vector<8x1xf32>
    %41 = vector.broadcast %40 : vector<8x1xf32> to vector<8x8xf32>
    %42 = arith.subf %38, %41 : vector<8x8xf32>
    %43 = math.exp %42 : vector<8x8xf32>
    %cst_39 = arith.constant dense<0.000000e+00> : vector<8xf32>
    %44 = vector.multi_reduction <add>, %43, %cst_39 [1] : vector<8x8xf32> to vector<8xf32>
    %45 = vector.shape_cast %44 : vector<8xf32> to vector<8x1xf32>
    %46 = tpu.reciprocal %45 {approx = true} : vector<8x1xf32> -> vector<8x1xf32>
    %47 = vector.broadcast %46 : vector<8x1xf32> to vector<8x8xf32>
    %48 = arith.mulf %43, %47 : vector<8x8xf32>
    %49 = arith.truncf %48 : vector<8x8xf32> to vector<8x8xbf16>
    %cst_40 = arith.constant dense<0.000000e+00> : vector<8x8xf32>
    %50 = tpu.matmul %49, %37, %cst_40 {dimension_numbers = #tpu.dot_dimension_numbers<[1], [0], [0], [1], [0, 0, 1, 1], [], []>} : vector<8x8xbf16>, vector<8x8xbf16>, vector<8x8xf32> -> vector<8x8xf32>
    %51 = arith.truncf %50 : vector<8x8xf32> to vector<8x8xbf16>
    %52 = vector.extract_strided_slice %7 {offsets = [0, 0], sizes = [8, 32], strides = [1, 1]} : vector<32x32xbf16> to vector<8x32xbf16>
    %cst_41 = arith.constant dense<0.000000e+00> : vector<8x32xf32>
    %53 = tpu.matmul %51, %52, %cst_41 {dimension_numbers = #tpu.dot_dimension_numbers<[1], [0], [0], [1], [0, 0, 1, 1], [], []>} : vector<8x8xbf16>, vector<8x32xbf16>, vector<8x32xf32> -> vector<8x32xf32>
    %54 = vector.extract_strided_slice %32 {offsets = [0, 8], sizes = [8, 8], strides = [1, 1]} : vector<8x32xbf16> to vector<8x8xbf16>
    %55 = vector.extract_strided_slice %33 {offsets = [0, 8], sizes = [8, 8], strides = [1, 1]} : vector<8x32xbf16> to vector<8x8xbf16>
    %56 = vector.extract_strided_slice %34 {offsets = [0, 8], sizes = [8, 8], strides = [1, 1]} : vector<8x32xbf16> to vector<8x8xbf16>
    %cst_42 = arith.constant dense<0.000000e+00> : vector<8x8xf32>
    %57 = tpu.matmul %54, %55, %cst_42 {dimension_numbers = #tpu.dot_dimension_numbers<[1], [1], [0], [0], [0, 0, 1, 0], [], []>} : vector<8x8xbf16>, vector<8x8xbf16>, vector<8x8xf32> -> vector<8x8xf32>
    %cst_43 = arith.constant dense<0xFF800000> : vector<8xf32>
    %58 = vector.multi_reduction <maximumf>, %57, %cst_43 [1] : vector<8x8xf32> to vector<8xf32>
    %59 = vector.shape_cast %58 : vector<8xf32> to vector<8x1xf32>
    %60 = vector.broadcast %59 : vector<8x1xf32> to vector<8x8xf32>
    %61 = arith.subf %57, %60 : vector<8x8xf32>
    %62 = math.exp %61 : vector<8x8xf32>
    %cst_44 = arith.constant dense<0.000000e+00> : vector<8xf32>
    %63 = vector.multi_reduction <add>, %62, %cst_44 [1] : vector<8x8xf32> to vector<8xf32>
    %64 = vector.shape_cast %63 : vector<8xf32> to vector<8x1xf32>
    %65 = tpu.reciprocal %64 {approx = true} : vector<8x1xf32> -> vector<8x1xf32>
    %66 = vector.broadcast %65 : vector<8x1xf32> to vector<8x8xf32>
    %67 = arith.mulf %62, %66 : vector<8x8xf32>
    %68 = arith.truncf %67 : vector<8x8xf32> to vector<8x8xbf16>
    %cst_45 = arith.constant dense<0.000000e+00> : vector<8x8xf32>
    %69 = tpu.matmul %68, %56, %cst_45 {dimension_numbers = #tpu.dot_dimension_numbers<[1], [0], [0], [1], [0, 0, 1, 1], [], []>} : vector<8x8xbf16>, vector<8x8xbf16>, vector<8x8xf32> -> vector<8x8xf32>
    %70 = arith.truncf %69 : vector<8x8xf32> to vector<8x8xbf16>
    %71 = vector.extract_strided_slice %7 {offsets = [8, 0], sizes = [8, 32], strides = [1, 1]} : vector<32x32xbf16> to vector<8x32xbf16>
    %cst_46 = arith.constant dense<0.000000e+00> : vector<8x32xf32>
    %72 = tpu.matmul %70, %71, %cst_46 {dimension_numbers = #tpu.dot_dimension_numbers<[1], [0], [0], [1], [0, 0, 1, 1], [], []>} : vector<8x8xbf16>, vector<8x32xbf16>, vector<8x32xf32> -> vector<8x32xf32>
    %73 = arith.addf %53, %72 : vector<8x32xf32>
    %74 = vector.extract_strided_slice %32 {offsets = [0, 16], sizes = [8, 8], strides = [1, 1]} : vector<8x32xbf16> to vector<8x8xbf16>
    %75 = vector.extract_strided_slice %33 {offsets = [0, 16], sizes = [8, 8], strides = [1, 1]} : vector<8x32xbf16> to vector<8x8xbf16>
    %76 = vector.extract_strided_slice %34 {offsets = [0, 16], sizes = [8, 8], strides = [1, 1]} : vector<8x32xbf16> to vector<8x8xbf16>
    %cst_47 = arith.constant dense<0.000000e+00> : vector<8x8xf32>
    %77 = tpu.matmul %74, %75, %cst_47 {dimension_numbers = #tpu.dot_dimension_numbers<[1], [1], [0], [0], [0, 0, 1, 0], [], []>} : vector<8x8xbf16>, vector<8x8xbf16>, vector<8x8xf32> -> vector<8x8xf32>
    %cst_48 = arith.constant dense<0xFF800000> : vector<8xf32>
    %78 = vector.multi_reduction <maximumf>, %77, %cst_48 [1] : vector<8x8xf32> to vector<8xf32>
    %79 = vector.shape_cast %78 : vector<8xf32> to vector<8x1xf32>
    %80 = vector.broadcast %79 : vector<8x1xf32> to vector<8x8xf32>
    %81 = arith.subf %77, %80 : vector<8x8xf32>
    %82 = math.exp %81 : vector<8x8xf32>
    %cst_49 = arith.constant dense<0.000000e+00> : vector<8xf32>
    %83 = vector.multi_reduction <add>, %82, %cst_49 [1] : vector<8x8xf32> to vector<8xf32>
    %84 = vector.shape_cast %83 : vector<8xf32> to vector<8x1xf32>
    %85 = tpu.reciprocal %84 {approx = true} : vector<8x1xf32> -> vector<8x1xf32>
    %86 = vector.broadcast %85 : vector<8x1xf32> to vector<8x8xf32>
    %87 = arith.mulf %82, %86 : vector<8x8xf32>
    %88 = arith.truncf %87 : vector<8x8xf32> to vector<8x8xbf16>
    %cst_50 = arith.constant dense<0.000000e+00> : vector<8x8xf32>
    %89 = tpu.matmul %88, %76, %cst_50 {dimension_numbers = #tpu.dot_dimension_numbers<[1], [0], [0], [1], [0, 0, 1, 1], [], []>} : vector<8x8xbf16>, vector<8x8xbf16>, vector<8x8xf32> -> vector<8x8xf32>
    %90 = arith.truncf %89 : vector<8x8xf32> to vector<8x8xbf16>
    %91 = vector.extract_strided_slice %7 {offsets = [16, 0], sizes = [8, 32], strides = [1, 1]} : vector<32x32xbf16> to vector<8x32xbf16>
    %cst_51 = arith.constant dense<0.000000e+00> : vector<8x32xf32>
    %92 = tpu.matmul %90, %91, %cst_51 {dimension_numbers = #tpu.dot_dimension_numbers<[1], [0], [0], [1], [0, 0, 1, 1], [], []>} : vector<8x8xbf16>, vector<8x32xbf16>, vector<8x32xf32> -> vector<8x32xf32>
    %93 = arith.addf %73, %92 : vector<8x32xf32>
    %94 = vector.extract_strided_slice %32 {offsets = [0, 24], sizes = [8, 8], strides = [1, 1]} : vector<8x32xbf16> to vector<8x8xbf16>
    %95 = vector.extract_strided_slice %33 {offsets = [0, 24], sizes = [8, 8], strides = [1, 1]} : vector<8x32xbf16> to vector<8x8xbf16>
    %96 = vector.extract_strided_slice %34 {offsets = [0, 24], sizes = [8, 8], strides = [1, 1]} : vector<8x32xbf16> to vector<8x8xbf16>
    %cst_52 = arith.constant dense<0.000000e+00> : vector<8x8xf32>
    %97 = tpu.matmul %94, %95, %cst_52 {dimension_numbers = #tpu.dot_dimension_numbers<[1], [1], [0], [0], [0, 0, 1, 0], [], []>} : vector<8x8xbf16>, vector<8x8xbf16>, vector<8x8xf32> -> vector<8x8xf32>
    %cst_53 = arith.constant dense<0xFF800000> : vector<8xf32>
    %98 = vector.multi_reduction <maximumf>, %97, %cst_53 [1] : vector<8x8xf32> to vector<8xf32>
    %99 = vector.shape_cast %98 : vector<8xf32> to vector<8x1xf32>
    %100 = vector.broadcast %99 : vector<8x1xf32> to vector<8x8xf32>
    %101 = arith.subf %97, %100 : vector<8x8xf32>
    %102 = math.exp %101 : vector<8x8xf32>
    %cst_54 = arith.constant dense<0.000000e+00> : vector<8xf32>
    %103 = vector.multi_reduction <add>, %102, %cst_54 [1] : vector<8x8xf32> to vector<8xf32>
    %104 = vector.shape_cast %103 : vector<8xf32> to vector<8x1xf32>
    %105 = tpu.reciprocal %104 {approx = true} : vector<8x1xf32> -> vector<8x1xf32>
    %106 = vector.broadcast %105 : vector<8x1xf32> to vector<8x8xf32>
    %107 = arith.mulf %102, %106 : vector<8x8xf32>
    %108 = arith.truncf %107 : vector<8x8xf32> to vector<8x8xbf16>
    %cst_55 = arith.constant dense<0.000000e+00> : vector<8x8xf32>
    %109 = tpu.matmul %108, %96, %cst_55 {dimension_numbers = #tpu.dot_dimension_numbers<[1], [0], [0], [1], [0, 0, 1, 1], [], []>} : vector<8x8xbf16>, vector<8x8xbf16>, vector<8x8xf32> -> vector<8x8xf32>
    %110 = arith.truncf %109 : vector<8x8xf32> to vector<8x8xbf16>
    %111 = vector.extract_strided_slice %7 {offsets = [24, 0], sizes = [8, 32], strides = [1, 1]} : vector<32x32xbf16> to vector<8x32xbf16>
    %cst_56 = arith.constant dense<0.000000e+00> : vector<8x32xf32>
    %112 = tpu.matmul %110, %111, %cst_56 {dimension_numbers = #tpu.dot_dimension_numbers<[1], [0], [0], [1], [0, 0, 1, 1], [], []>} : vector<8x8xbf16>, vector<8x32xbf16>, vector<8x32xf32> -> vector<8x32xf32>
    %113 = arith.addf %93, %112 : vector<8x32xf32>
    %114 = vector.extract_strided_slice %29 {offsets = [8, 0], sizes = [8, 32], strides = [1, 1]} : vector<16x32xbf16> to vector<8x32xbf16>
    %115 = vector.extract_strided_slice %30 {offsets = [8, 0], sizes = [8, 32], strides = [1, 1]} : vector<16x32xbf16> to vector<8x32xbf16>
    %116 = vector.extract_strided_slice %31 {offsets = [8, 0], sizes = [8, 32], strides = [1, 1]} : vector<16x32xbf16> to vector<8x32xbf16>
    %117 = vector.extract_strided_slice %114 {offsets = [0, 0], sizes = [8, 8], strides = [1, 1]} : vector<8x32xbf16> to vector<8x8xbf16>
    %118 = vector.extract_strided_slice %115 {offsets = [0, 0], sizes = [8, 8], strides = [1, 1]} : vector<8x32xbf16> to vector<8x8xbf16>
    %119 = vector.extract_strided_slice %116 {offsets = [0, 0], sizes = [8, 8], strides = [1, 1]} : vector<8x32xbf16> to vector<8x8xbf16>
    %cst_57 = arith.constant dense<0.000000e+00> : vector<8x8xf32>
    %120 = tpu.matmul %117, %118, %cst_57 {dimension_numbers = #tpu.dot_dimension_numbers<[1], [1], [0], [0], [0, 0, 1, 0], [], []>} : vector<8x8xbf16>, vector<8x8xbf16>, vector<8x8xf32> -> vector<8x8xf32>
    %cst_58 = arith.constant dense<0xFF800000> : vector<8xf32>
    %121 = vector.multi_reduction <maximumf>, %120, %cst_58 [1] : vector<8x8xf32> to vector<8xf32>
    %122 = vector.shape_cast %121 : vector<8xf32> to vector<8x1xf32>
    %123 = vector.broadcast %122 : vector<8x1xf32> to vector<8x8xf32>
    %124 = arith.subf %120, %123 : vector<8x8xf32>
    %125 = math.exp %124 : vector<8x8xf32>
    %cst_59 = arith.constant dense<0.000000e+00> : vector<8xf32>
    %126 = vector.multi_reduction <add>, %125, %cst_59 [1] : vector<8x8xf32> to vector<8xf32>
    %127 = vector.shape_cast %126 : vector<8xf32> to vector<8x1xf32>
    %128 = tpu.reciprocal %127 {approx = true} : vector<8x1xf32> -> vector<8x1xf32>
    %129 = vector.broadcast %128 : vector<8x1xf32> to vector<8x8xf32>
    %130 = arith.mulf %125, %129 : vector<8x8xf32>
    %131 = arith.truncf %130 : vector<8x8xf32> to vector<8x8xbf16>
    %cst_60 = arith.constant dense<0.000000e+00> : vector<8x8xf32>
    %132 = tpu.matmul %131, %119, %cst_60 {dimension_numbers = #tpu.dot_dimension_numbers<[1], [0], [0], [1], [0, 0, 1, 1], [], []>} : vector<8x8xbf16>, vector<8x8xbf16>, vector<8x8xf32> -> vector<8x8xf32>
    %133 = arith.truncf %132 : vector<8x8xf32> to vector<8x8xbf16>
    %134 = vector.extract_strided_slice %7 {offsets = [0, 0], sizes = [8, 32], strides = [1, 1]} : vector<32x32xbf16> to vector<8x32xbf16>
    %cst_61 = arith.constant dense<0.000000e+00> : vector<8x32xf32>
    %135 = tpu.matmul %133, %134, %cst_61 {dimension_numbers = #tpu.dot_dimension_numbers<[1], [0], [0], [1], [0, 0, 1, 1], [], []>} : vector<8x8xbf16>, vector<8x32xbf16>, vector<8x32xf32> -> vector<8x32xf32>
    %136 = vector.extract_strided_slice %114 {offsets = [0, 8], sizes = [8, 8], strides = [1, 1]} : vector<8x32xbf16> to vector<8x8xbf16>
    %137 = vector.extract_strided_slice %115 {offsets = [0, 8], sizes = [8, 8], strides = [1, 1]} : vector<8x32xbf16> to vector<8x8xbf16>
    %138 = vector.extract_strided_slice %116 {offsets = [0, 8], sizes = [8, 8], strides = [1, 1]} : vector<8x32xbf16> to vector<8x8xbf16>
    %cst_62 = arith.constant dense<0.000000e+00> : vector<8x8xf32>
    %139 = tpu.matmul %136, %137, %cst_62 {dimension_numbers = #tpu.dot_dimension_numbers<[1], [1], [0], [0], [0, 0, 1, 0], [], []>} : vector<8x8xbf16>, vector<8x8xbf16>, vector<8x8xf32> -> vector<8x8xf32>
    %cst_63 = arith.constant dense<0xFF800000> : vector<8xf32>
    %140 = vector.multi_reduction <maximumf>, %139, %cst_63 [1] : vector<8x8xf32> to vector<8xf32>
    %141 = vector.shape_cast %140 : vector<8xf32> to vector<8x1xf32>
    %142 = vector.broadcast %141 : vector<8x1xf32> to vector<8x8xf32>
    %143 = arith.subf %139, %142 : vector<8x8xf32>
    %144 = math.exp %143 : vector<8x8xf32>
    %cst_64 = arith.constant dense<0.000000e+00> : vector<8xf32>
    %145 = vector.multi_reduction <add>, %144, %cst_64 [1] : vector<8x8xf32> to vector<8xf32>
    %146 = vector.shape_cast %145 : vector<8xf32> to vector<8x1xf32>
    %147 = tpu.reciprocal %146 {approx = true} : vector<8x1xf32> -> vector<8x1xf32>
    %148 = vector.broadcast %147 : vector<8x1xf32> to vector<8x8xf32>
    %149 = arith.mulf %144, %148 : vector<8x8xf32>
    %150 = arith.truncf %149 : vector<8x8xf32> to vector<8x8xbf16>
    %cst_65 = arith.constant dense<0.000000e+00> : vector<8x8xf32>
    %151 = tpu.matmul %150, %138, %cst_65 {dimension_numbers = #tpu.dot_dimension_numbers<[1], [0], [0], [1], [0, 0, 1, 1], [], []>} : vector<8x8xbf16>, vector<8x8xbf16>, vector<8x8xf32> -> vector<8x8xf32>
    %152 = arith.truncf %151 : vector<8x8xf32> to vector<8x8xbf16>
    %153 = vector.extract_strided_slice %7 {offsets = [8, 0], sizes = [8, 32], strides = [1, 1]} : vector<32x32xbf16> to vector<8x32xbf16>
    %cst_66 = arith.constant dense<0.000000e+00> : vector<8x32xf32>
    %154 = tpu.matmul %152, %153, %cst_66 {dimension_numbers = #tpu.dot_dimension_numbers<[1], [0], [0], [1], [0, 0, 1, 1], [], []>} : vector<8x8xbf16>, vector<8x32xbf16>, vector<8x32xf32> -> vector<8x32xf32>
    %155 = arith.addf %135, %154 : vector<8x32xf32>
    %156 = vector.extract_strided_slice %114 {offsets = [0, 16], sizes = [8, 8], strides = [1, 1]} : vector<8x32xbf16> to vector<8x8xbf16>
    %157 = vector.extract_strided_slice %115 {offsets = [0, 16], sizes = [8, 8], strides = [1, 1]} : vector<8x32xbf16> to vector<8x8xbf16>
    %158 = vector.extract_strided_slice %116 {offsets = [0, 16], sizes = [8, 8], strides = [1, 1]} : vector<8x32xbf16> to vector<8x8xbf16>
    %cst_67 = arith.constant dense<0.000000e+00> : vector<8x8xf32>
    %159 = tpu.matmul %156, %157, %cst_67 {dimension_numbers = #tpu.dot_dimension_numbers<[1], [1], [0], [0], [0, 0, 1, 0], [], []>} : vector<8x8xbf16>, vector<8x8xbf16>, vector<8x8xf32> -> vector<8x8xf32>
    %cst_68 = arith.constant dense<0xFF800000> : vector<8xf32>
    %160 = vector.multi_reduction <maximumf>, %159, %cst_68 [1] : vector<8x8xf32> to vector<8xf32>
    %161 = vector.shape_cast %160 : vector<8xf32> to vector<8x1xf32>
    %162 = vector.broadcast %161 : vector<8x1xf32> to vector<8x8xf32>
    %163 = arith.subf %159, %162 : vector<8x8xf32>
    %164 = math.exp %163 : vector<8x8xf32>
    %cst_69 = arith.constant dense<0.000000e+00> : vector<8xf32>
    %165 = vector.multi_reduction <add>, %164, %cst_69 [1] : vector<8x8xf32> to vector<8xf32>
    %166 = vector.shape_cast %165 : vector<8xf32> to vector<8x1xf32>
    %167 = tpu.reciprocal %166 {approx = true} : vector<8x1xf32> -> vector<8x1xf32>
    %168 = vector.broadcast %167 : vector<8x1xf32> to vector<8x8xf32>
    %169 = arith.mulf %164, %168 : vector<8x8xf32>
    %170 = arith.truncf %169 : vector<8x8xf32> to vector<8x8xbf16>
    %cst_70 = arith.constant dense<0.000000e+00> : vector<8x8xf32>
    %171 = tpu.matmul %170, %158, %cst_70 {dimension_numbers = #tpu.dot_dimension_numbers<[1], [0], [0], [1], [0, 0, 1, 1], [], []>} : vector<8x8xbf16>, vector<8x8xbf16>, vector<8x8xf32> -> vector<8x8xf32>
    %172 = arith.truncf %171 : vector<8x8xf32> to vector<8x8xbf16>
    %173 = vector.extract_strided_slice %7 {offsets = [16, 0], sizes = [8, 32], strides = [1, 1]} : vector<32x32xbf16> to vector<8x32xbf16>
    %cst_71 = arith.constant dense<0.000000e+00> : vector<8x32xf32>
    %174 = tpu.matmul %172, %173, %cst_71 {dimension_numbers = #tpu.dot_dimension_numbers<[1], [0], [0], [1], [0, 0, 1, 1], [], []>} : vector<8x8xbf16>, vector<8x32xbf16>, vector<8x32xf32> -> vector<8x32xf32>
    %175 = arith.addf %155, %174 : vector<8x32xf32>
    %176 = vector.extract_strided_slice %114 {offsets = [0, 24], sizes = [8, 8], strides = [1, 1]} : vector<8x32xbf16> to vector<8x8xbf16>
    %177 = vector.extract_strided_slice %115 {offsets = [0, 24], sizes = [8, 8], strides = [1, 1]} : vector<8x32xbf16> to vector<8x8xbf16>
    %178 = vector.extract_strided_slice %116 {offsets = [0, 24], sizes = [8, 8], strides = [1, 1]} : vector<8x32xbf16> to vector<8x8xbf16>
    %cst_72 = arith.constant dense<0.000000e+00> : vector<8x8xf32>
    %179 = tpu.matmul %176, %177, %cst_72 {dimension_numbers = #tpu.dot_dimension_numbers<[1], [1], [0], [0], [0, 0, 1, 0], [], []>} : vector<8x8xbf16>, vector<8x8xbf16>, vector<8x8xf32> -> vector<8x8xf32>
    %cst_73 = arith.constant dense<0xFF800000> : vector<8xf32>
    %180 = vector.multi_reduction <maximumf>, %179, %cst_73 [1] : vector<8x8xf32> to vector<8xf32>
    %181 = vector.shape_cast %180 : vector<8xf32> to vector<8x1xf32>
    %182 = vector.broadcast %181 : vector<8x1xf32> to vector<8x8xf32>
    %183 = arith.subf %179, %182 : vector<8x8xf32>
    %184 = math.exp %183 : vector<8x8xf32>
    %cst_74 = arith.constant dense<0.000000e+00> : vector<8xf32>
    %185 = vector.multi_reduction <add>, %184, %cst_74 [1] : vector<8x8xf32> to vector<8xf32>
    %186 = vector.shape_cast %185 : vector<8xf32> to vector<8x1xf32>
    %187 = tpu.reciprocal %186 {approx = true} : vector<8x1xf32> -> vector<8x1xf32>
    %188 = vector.broadcast %187 : vector<8x1xf32> to vector<8x8xf32>
    %189 = arith.mulf %184, %188 : vector<8x8xf32>
    %190 = arith.truncf %189 : vector<8x8xf32> to vector<8x8xbf16>
    %cst_75 = arith.constant dense<0.000000e+00> : vector<8x8xf32>
    %191 = tpu.matmul %190, %178, %cst_75 {dimension_numbers = #tpu.dot_dimension_numbers<[1], [0], [0], [1], [0, 0, 1, 1], [], []>} : vector<8x8xbf16>, vector<8x8xbf16>, vector<8x8xf32> -> vector<8x8xf32>
    %192 = arith.truncf %191 : vector<8x8xf32> to vector<8x8xbf16>
    %193 = vector.extract_strided_slice %7 {offsets = [24, 0], sizes = [8, 32], strides = [1, 1]} : vector<32x32xbf16> to vector<8x32xbf16>
    %cst_76 = arith.constant dense<0.000000e+00> : vector<8x32xf32>
    %194 = tpu.matmul %192, %193, %cst_76 {dimension_numbers = #tpu.dot_dimension_numbers<[1], [0], [0], [1], [0, 0, 1, 1], [], []>} : vector<8x8xbf16>, vector<8x32xbf16>, vector<8x32xf32> -> vector<8x32xf32>
    %195 = arith.addf %175, %194 : vector<8x32xf32>
    %196 = tpu.concatenate %113, %195 in 0 : vector<8x32xf32>, vector<8x32xf32> -> vector<16x32xf32>
    %197 = vector.broadcast %11 : vector<1x32xf32> to vector<16x32xf32>
    %198 = arith.addf %196, %197 : vector<16x32xf32>
    %199 = arith.addf %0, %198 : vector<16x32xf32>
    %cst_77 = arith.constant dense<0.000000e+00> : vector<16xf32>
    %200 = vector.multi_reduction <add>, %199, %cst_77 [1] : vector<16x32xf32> to vector<16xf32>
    %201 = vector.shape_cast %200 : vector<16xf32> to vector<16x1xf32>
    %cst_78 = arith.constant 3.200000e+01 : f32
    %202 = vector.broadcast %cst_78 : f32 to vector<16x1xf32>
    %203 = arith.divf %201, %202 : vector<16x1xf32>
    %204 = vector.broadcast %203 : vector<16x1xf32> to vector<16x32xf32>
    %205 = arith.subf %199, %204 : vector<16x32xf32>
    %206 = arith.mulf %205, %205 : vector<16x32xf32>
    %cst_79 = arith.constant dense<0.000000e+00> : vector<16xf32>
    %207 = vector.multi_reduction <add>, %206, %cst_79 [1] : vector<16x32xf32> to vector<16xf32>
    %208 = vector.shape_cast %207 : vector<16xf32> to vector<16x1xf32>
    %cst_80 = arith.constant 3.200000e+01 : f32
    %209 = vector.broadcast %cst_80 : f32 to vector<16x1xf32>
    %210 = arith.divf %208, %209 : vector<16x1xf32>
    %211 = vector.broadcast %203 : vector<16x1xf32> to vector<16x32xf32>
    %212 = arith.subf %199, %211 : vector<16x32xf32>
    %cst_81 = arith.constant 9.99999974E-6 : f32
    %213 = vector.broadcast %cst_81 : f32 to vector<16x1xf32>
    %214 = arith.addf %210, %213 : vector<16x1xf32>
    %215 = math.rsqrt %214 : vector<16x1xf32>
    %216 = vector.broadcast %215 : vector<16x1xf32> to vector<16x32xf32>
    %217 = arith.mulf %212, %216 : vector<16x32xf32>
    %218 = vector.broadcast %16 : vector<1x32xf32> to vector<16x32xf32>
    %219 = arith.mulf %217, %218 : vector<16x32xf32>
    %220 = vector.broadcast %17 : vector<1x32xf32> to vector<16x32xf32>
    %221 = arith.addf %219, %220 : vector<16x32xf32>
    %222 = arith.truncf %221 : vector<16x32xf32> to vector<16x32xbf16>
    %cst_82 = arith.constant dense<0.000000e+00> : vector<16x64xf32>
    %223 = tpu.matmul %222, %12, %cst_82 {dimension_numbers = #tpu.dot_dimension_numbers<[1], [0], [0], [1], [0, 0, 1, 1], [], []>} : vector<16x32xbf16>, vector<32x64xbf16>, vector<16x64xf32> -> vector<16x64xf32>
    %224 = vector.broadcast %13 : vector<1x64xf32> to vector<16x64xf32>
    %225 = arith.addf %223, %224 : vector<16x64xf32>
    %cst_83 = arith.constant 0.000000e+00 : f32
    %226 = vector.broadcast %cst_83 : f32 to vector<16x64xf32>
    %227 = arith.maximumf %225, %226 : vector<16x64xf32>
    %228 = arith.truncf %227 : vector<16x64xf32> to vector<16x64xbf16>
    %cst_84 = arith.constant dense<0.000000e+00> : vector<16x32xf32>
    %229 = tpu.matmul %228, %14, %cst_84 {dimension_numbers = #tpu.dot_dimension_numbers<[1], [0], [0], [1], [0, 0, 1, 1], [], []>} : vector<16x64xbf16>, vector<64x32xbf16>, vector<16x32xf32> -> vector<16x32xf32>
    %230 = vector.broadcast %15 : vector<1x32xf32> to vector<16x32xf32>
    %231 = arith.addf %229, %230 : vector<16x32xf32>
    %232 = arith.addf %221, %231 : vector<16x32xf32>
    %cst_85 = arith.constant dense<0.000000e+00> : vector<16xf32>
    %233 = vector.multi_reduction <add>, %232, %cst_85 [1] : vector<16x32xf32> to vector<16xf32>
    %234 = vector.shape_cast %233 : vector<16xf32> to vector<16x1xf32>
    %cst_86 = arith.constant 3.200000e+01 : f32
    %235 = vector.broadcast %cst_86 : f32 to vector<16x1xf32>
    %236 = arith.divf %234, %235 : vector<16x1xf32>
    %237 = vector.broadcast %236 : vector<16x1xf32> to vector<16x32xf32>
    %238 = arith.subf %232, %237 : vector<16x32xf32>
    %239 = arith.mulf %238, %238 : vector<16x32xf32>
    %cst_87 = arith.constant dense<0.000000e+00> : vector<16xf32>
    %240 = vector.multi_reduction <add>, %239, %cst_87 [1] : vector<16x32xf32> to vector<16xf32>
    %241 = vector.shape_cast %240 : vector<16xf32> to vector<16x1xf32>
    %cst_88 = arith.constant 3.200000e+01 : f32
    %242 = vector.broadcast %cst_88 : f32 to vector<16x1xf32>
    %243 = arith.divf %241, %242 : vector<16x1xf32>
    %244 = vector.broadcast %236 : vector<16x1xf32> to vector<16x32xf32>
    %245 = arith.subf %232, %244 : vector<16x32xf32>
    %cst_89 = arith.constant 9.99999974E-6 : f32
    %246 = vector.broadcast %cst_89 : f32 to vector<16x1xf32>
    %247 = arith.addf %243, %246 : vector<16x1xf32>
    %248 = math.rsqrt %247 : vector<16x1xf32>
    %249 = vector.broadcast %248 : vector<16x1xf32> to vector<16x32xf32>
    %250 = arith.mulf %245, %249 : vector<16x32xf32>
    %251 = vector.broadcast %18 : vector<1x32xf32> to vector<16x32xf32>
    %252 = arith.mulf %250, %251 : vector<16x32xf32>
    %253 = vector.broadcast %19 : vector<1x32xf32> to vector<16x32xf32>
    %254 = arith.addf %252, %253 : vector<16x32xf32>
    %c0_90 = arith.constant 0 : index
    %c0_91 = arith.constant 0 : index
    %255 = vector.load %arg19[%c0_90, %c0_91] : memref<16x32xf32, #tpu.memory_space<vmem>>, vector<16x32xf32>
    tpu.vector_store %arg19[%c0_90, %c0_91], %254 {strides = array<i32>} : memref<16x32xf32, #tpu.memory_space<vmem>>, vector<16x32xf32>,
    return
  }
  func.func @transform_0(%arg0: i32) -> (i32, i32) {
    %c0_i32 = arith.constant 0 : i32
    %c0_i32_0 = arith.constant 0 : i32
    return %arg0, %c0_i32 : i32, i32
  }
  func.func @transform_1(%arg0: i32) -> (i32, i32) {
    %c0_i32 = arith.constant 0 : i32
    %c0_i32_0 = arith.constant 0 : i32
    return %arg0, %c0_i32 : i32, i32
  }
  func.func @transform_2(%arg0: i32) -> (i32, i32) {
    %c0_i32 = arith.constant 0 : i32
    %c0_i32_0 = arith.constant 0 : i32
    %c0_i32_1 = arith.constant 0 : i32
    return %c0_i32, %c0_i32_0 : i32, i32
  }
  func.func @transform_3(%arg0: i32) -> (i32, i32) {
    %c0_i32 = arith.constant 0 : i32
    %c0_i32_0 = arith.constant 0 : i32
    %c0_i32_1 = arith.constant 0 : i32
    return %c0_i32, %c0_i32_0 : i32, i32
  }
  func.func @transform_4(%arg0: i32) -> (i32, i32) {
    %c0_i32 = arith.constant 0 : i32
    %c0_i32_0 = arith.constant 0 : i32
    %c0_i32_1 = arith.constant 0 : i32
    return %c0_i32, %c0_i32_0 : i32, i32
  }
  func.func @transform_5(%arg0: i32) -> (i32, i32) {
    %c0_i32 = arith.constant 0 : i32
    %c0_i32_0 = arith.constant 0 : i32
    %c0_i32_1 = arith.constant 0 : i32
    return %c0_i32, %c0_i32_0 : i32, i32
  }
  func.func @transform_6(%arg0: i32) -> (i32, i32) {
    %c0_i32 = arith.constant 0 : i32
    %c0_i32_0 = arith.constant 0 : i32
    %c0_i32_1 = arith.constant 0 : i32
    return %c0_i32, %c0_i32_0 : i32, i32
  }
  func.func @transform_7(%arg0: i32) -> (i32, i32) {
    %c0_i32 = arith.constant 0 : i32
    %c0_i32_0 = arith.constant 0 : i32
    %c0_i32_1 = arith.constant 0 : i32
    return %c0_i32, %c0_i32_0 : i32, i32
  }
  func.func @transform_8(%arg0: i32) -> (i32, i32) {
    %c0_i32 = arith.constant 0 : i32
    %c0_i32_0 = arith.constant 0 : i32
    %c0_i32_1 = arith.constant 0 : i32
    return %c0_i32, %c0_i32_0 : i32, i32
  }
  func.func @transform_9(%arg0: i32) -> (i32, i32) {
    %c0_i32 = arith.constant 0 : i32
    %c0_i32_0 = arith.constant 0 : i32
    %c0_i32_1 = arith.constant 0 : i32
    return %c0_i32, %c0_i32_0 : i32, i32
  }
  func.func @transform_10(%arg0: i32) -> (i32, i32) {
    %c0_i32 = arith.constant 0 : i32
    %c0_i32_0 = arith.constant 0 : i32
    %c0_i32_1 = arith.constant 0 : i32
    return %c0_i32, %c0_i32_0 : i32, i32
  }
  func.func @transform_11(%arg0: i32) -> (i32, i32) {
    %c0_i32 = arith.constant 0 : i32
    %c0_i32_0 = arith.constant 0 : i32
    %c0_i32_1 = arith.constant 0 : i32
    return %c0_i32, %c0_i32_0 : i32, i32
  }
  func.func @transform_12(%arg0: i32) -> (i32, i32) {
    %c0_i32 = arith.constant 0 : i32
    %c0_i32_0 = arith.constant 0 : i32
    %c0_i32_1 = arith.constant 0 : i32
    return %c0_i32, %c0_i32_0 : i32, i32
  }
  func.func @transform_13(%arg0: i32) -> (i32, i32) {
    %c0_i32 = arith.constant 0 : i32
    %c0_i32_0 = arith.constant 0 : i32
    %c0_i32_1 = arith.constant 0 : i32
    return %c0_i32, %c0_i32_0 : i32, i32
  }
  func.func @transform_14(%arg0: i32) -> (i32, i32) {
    %c0_i32 = arith.constant 0 : i32
    %c0_i32_0 = arith.constant 0 : i32
    %c0_i32_1 = arith.constant 0 : i32
    return %c0_i32, %c0_i32_0 : i32, i32
  }
  func.func @transform_15(%arg0: i32) -> (i32, i32) {
    %c0_i32 = arith.constant 0 : i32
    %c0_i32_0 = arith.constant 0 : i32
    %c0_i32_1 = arith.constant 0 : i32
    return %c0_i32, %c0_i32_0 : i32, i32
  }
  func.func @transform_16(%arg0: i32) -> (i32, i32) {
    %c0_i32 = arith.constant 0 : i32
    %c0_i32_0 = arith.constant 0 : i32
    %c0_i32_1 = arith.constant 0 : i32
    return %c0_i32, %c0_i32_0 : i32, i32
  }
  func.func @transform_17(%arg0: i32) -> (i32, i32) {
    %c0_i32 = arith.constant 0 : i32
    %c0_i32_0 = arith.constant 0 : i32
    %c0_i32_1 = arith.constant 0 : i32
    return %c0_i32, %c0_i32_0 : i32, i32
  }
  func.func @transform_18(%arg0: i32) -> (i32, i32) {
    %c0_i32 = arith.constant 0 : i32
    %c0_i32_0 = arith.constant 0 : i32
    return %arg0, %c0_i32 : i32, i32
  }
}

</mosaic_0001>

<bundles_post_ra>
// kernel: tpu_custom_call.1
= control target key start
LH: loop header
LB: loop body
LE: loop exit
PB: predicated region body
PF: predicated region fallthrough
CT: control target
= control target key end

     0   :  { %s2889_s0 = inlined_call_operand.vmem [shape: f32[16,32], index: 0, kind: input, shape index: {}]   ;;  %s2890_s1 = inlined_call_operand.vmem [shape: f32[16,32], index: 1, kind: input, shape index: {}]   ;;  %s2891_s2 = inlined_call_operand.vmem [shape: bf16[32,32], index: 2, kind: input, shape index: {}]   ;;  %s2892_s3 = inlined_call_operand.hbm [shape: bf16[32,32], index: 3, kind: input, shape index: {}]   ;;  %s2893_s4 = inlined_call_operand.hbm [shape: bf16[32,32], index: 4, kind: input, shape index: {}]   ;;  %s2894_s5 = inlined_call_operand.vmem [shape: f32[1,32], index: 5, kind: input, shape index: {}]   ;;  %s2895_s6 = inlined_call_operand.vmem [shape: f32[1,32], index: 6, kind: input, shape index: {}]   ;;  %s2896_s7 = inlined_call_operand.hbm [shape: f32[1,32], index: 7, kind: input, shape index: {}]   ;;  %s2897_s8 = inlined_call_operand.hbm [shape: bf16[32,32], index: 8, kind: input, shape index: {}]   ;;  %s2898_s9 = inlined_call_operand.hbm [shape: f32[1,32], index: 9, kind: input, shape index: {}]   ;;  %s2899_s10 = inlined_call_operand.vmem [shape: bf16[32,64], index: 10, kind: input, shape index: {}]   ;;  %s2900_s11 = inlined_call_operand.vmem [shape: f32[1,64], index: 11, kind: input, shape index: {}]   ;;  %s2901_s12 = inlined_call_operand.vmem [shape: bf16[64,32], index: 12, kind: input, shape index: {}]   ;;  %s2902_s13 = inlined_call_operand.vmem [shape: f32[1,32], index: 13, kind: input, shape index: {}]   ;;  %s2903_s14 = inlined_call_operand.vmem [shape: f32[1,32], index: 14, kind: input, shape index: {}]   ;;  %s2904_s15 = inlined_call_operand.vmem [shape: f32[1,32], index: 15, kind: input, shape index: {}]   ;;  %s2905_s16 = inlined_call_operand.vmem [shape: f32[1,32], index: 16, kind: input, shape index: {}]   ;;  %s2906_s17 = inlined_call_operand.vmem [shape: f32[1,32], index: 17, kind: input, shape index: {}]   ;;  %s2907_s18 = inlined_call_operand.hbm [shape: f32[16,32], index: 18, kind: output, shape index: {}]  }
   0x1   :  { %2911 = sst [smem:[#allocation16_spill]] %s2889_s0 }
   0x2   :  { %2912 = sst [smem:[#allocation17_spill]] %s2890_s1 }
   0x3   :  { %2913 = sst [smem:[#allocation18_spill]] %s2891_s2 }
   0x4   :  { %23 = vsyncpa [#allocation3], 0 }
   0x5   :  { %24 = vsyncpa [#allocation6], 0 }
   0x6   :  { %25 = vsyncpa [#allocation9], 0 }
   0x7   :  { %26 = vsyncpa [#allocation4], 0  ;;  %s2370_s27 = smov [#allocation5]   ;;  %s2371_s29 = smov [#allocation8]  }
   0x8   :  { %s50_s28 = sshll.u32 %s2370_s27, 4  ;;  %s76_s30 = sshll.u32 %s2371_s29, 4  ;;  %s51_s28 = int_to_ptr.vmem [resolvable:$true] %s50_s28  ;;  %s2480_s30 = int_to_ptr.vmem [resolvable:$true] %s76_s30 }
   0x9   :  { %s2230_s1 = scalar_lea.hbm %s2893_s4, 256 }
   0xa   :  { %p2231_p0 = scmp.ne.s32.totalorder %s2893_s4, %s2230_s1  ;;  %p2234_p1 = scmp.lt.u32.totalorder %s2230_s1, %s2893_s4 }
   0xc   :  { %p2236_p2 = pnand %p2234_p1, %p2231_p0 }
   0xe   :  { %2239 = shalt.err (!%p2236_p2)
}
   0xf   :  { %s2240_s23 = scalar_lea.vmem %s51_s28, 256  ;;  %p2245_p4 = scmp.lt.s32.totalorder %s51_s28, %s51_s28 }
  0x10   :  { %p2241_p3 = scmp.ne.s32.totalorder %s51_s28, %s2240_s23  ;;  %p2246_p5 = scmp.lt.s32.totalorder %s2240_s23, %s2240_s23 }
  0x12   :  { %p2247_p6 = por %p2246_p5, %p2245_p4 }
  0x14   :  { %p2248_p7 = pnand %p2247_p6, %p2241_p3 }
  0x16   :  { %2251 = shalt.err (!%p2248_p7)
}
  0x17   :  { %s2372_s24 = smov 64   ;;  %s2373_s25 = smov 4  }
  0x18   :  { %56 = dma.hbm_to_vmem [thread:$0]  %s2893_s4, 256, %s51_s28, [#allocation6], %s2372_s24, %s2372_s24, %s2373_s25  }
  0x19   :  { %s2252_s19 = scalar_lea.hbm %s2897_s8, 256 }
  0x1a   :  { %p2253_p8 = scmp.ne.s32.totalorder %s2897_s8, %s2252_s19  ;;  %p2256_p9 = scmp.lt.u32.totalorder %s2252_s19, %s2897_s8 }
  0x1c   :  { %p2258_p10 = pnand %p2256_p9, %p2253_p8 }
  0x1e   :  { %2261 = shalt.err (!%p2258_p10)
}
  0x1f   :  { %s2262_s2 = scalar_lea.vmem %s2480_s30, 256  ;;  %p2267_p12 = scmp.lt.s32.totalorder %s2480_s30, %s2480_s30 }
  0x20   :  { %p2263_p11 = scmp.ne.s32.totalorder %s2480_s30, %s2262_s2  ;;  %p2268_p13 = scmp.lt.s32.totalorder %s2262_s2, %s2262_s2 }
  0x22   :  { %p2269_p0 = por %p2268_p13, %p2267_p12 }
  0x24   :  { %p2270_p1 = pnand %p2269_p0, %p2263_p11 }
  0x26   :  { %2273 = shalt.err (!%p2270_p1)
}
  0x27   :  { %82 = dma.hbm_to_vmem [thread:$0]  %s2897_s8, 256, %s2480_s30, [#allocation9], %s2372_s24, %s2372_s24, %s2373_s25  }
  0x28   :  { %s2374_s23 = smov [#allocation2]   ;;  %s2375_s27 = smov [#allocation7]  }
  0x29   :  { %s38_s26 = sshll.u32 %s2374_s23, 4  ;;  %s67_s29 = sshll.u32 %s2375_s27, 4  ;;  %s39_s26 = int_to_ptr.vmem [resolvable:$true] %s38_s26  ;;  %s68_s29 = int_to_ptr.vmem [resolvable:$true] %s67_s29 }
  0x2a   :  { %s2274_s1 = scalar_lea.hbm %s2892_s3, 256 }
  0x2b   :  { %p2275_p2 = scmp.ne.s32.totalorder %s2892_s3, %s2274_s1  ;;  %p2278_p3 = scmp.lt.u32.totalorder %s2274_s1, %s2892_s3 }
  0x2d   :  { %p2280_p4 = pnand %p2278_p3, %p2275_p2 }
  0x2f   :  { %2283 = shalt.err (!%p2280_p4)
}
  0x30   :  { %s2284_s8 = scalar_lea.vmem %s39_s26, 256  ;;  %p2289_p6 = scmp.lt.s32.totalorder %s39_s26, %s39_s26 }
  0x31   :  { %p2285_p5 = scmp.ne.s32.totalorder %s39_s26, %s2284_s8  ;;  %p2290_p7 = scmp.lt.s32.totalorder %s2284_s8, %s2284_s8 }
  0x33   :  { %p2291_p8 = por %p2290_p7, %p2289_p6 }
  0x35   :  { %p2292_p9 = pnand %p2291_p8, %p2285_p5 }
  0x37   :  { %2295 = shalt.err (!%p2292_p9)
}
  0x38   :  { %44 = dma.hbm_to_vmem [thread:$0]  %s2892_s3, 256, %s39_s26, [#allocation3], %s2372_s24, %s2372_s24, %s2373_s25  }
  0x39   :  { %s2296_s27 = scalar_lea.hbm %s2896_s7, 16 }
  0x3a   :  { %p2297_p10 = scmp.ne.s32.totalorder %s2896_s7, %s2296_s27  ;;  %p2300_p11 = scmp.lt.u32.totalorder %s2296_s27, %s2896_s7 }
  0x3c   :  { %p2302_p12 = pnand %p2300_p11, %p2297_p10 }
  0x3e   :  { %2305 = shalt.err (!%p2302_p12)
}
  0x3f   :  { %s2306_s21 = scalar_lea.vmem %s68_s29, 16  ;;  %s2310_s22 = scalar_lea.vmem %s68_s29, 32 }
  0x40   :  { %p2307_p13 = scmp.ne.s32.totalorder %s68_s29, %s2306_s21  ;;  %p2311_p0 = scmp.lt.s32.totalorder %s68_s29, %s68_s29 }
  0x41   :  { %p2312_p1 = scmp.lt.s32.totalorder %s2310_s22, %s2306_s21 }
  0x43   :  { %p2313_p2 = por %p2312_p1, %p2311_p0 }
  0x45   :  { %p2314_p3 = pnand %p2313_p2, %p2307_p13 }
  0x47   :  { %2317 = shalt.err (!%p2314_p3)
}
  0x48   :  { %70 = dma.hbm_to_vmem [thread:$0]  %s2896_s7, 16, %s68_s29, [#allocation6]  }
  0x49   :  { %s2376_s25 = smov [#allocation10]   ;;  %s2318_s30 = scalar_lea.hbm %s2898_s9, 16 }
  0x4a   :  { %s89_s26 = sshll.u32 %s2376_s25, 4  ;;  %p2319_p4 = scmp.ne.s32.totalorder %s2898_s9, %s2318_s30  ;;  %s90_s26 = int_to_ptr.vmem [resolvable:$true] %s89_s26 }
  0x4b   :  { %p2322_p5 = scmp.lt.u32.totalorder %s2318_s30, %s2898_s9 }
  0x4d   :  { %p2324_p6 = pnand %p2322_p5, %p2319_p4 }
  0x4f   :  { %2327 = shalt.err (!%p2324_p6)
}
  0x50   :  { %s2328_s0 = scalar_lea.vmem %s90_s26, 16  ;;  %s2332_s7 = scalar_lea.vmem %s90_s26, 32 }
  0x51   :  { %p2329_p7 = scmp.ne.s32.totalorder %s90_s26, %s2328_s0  ;;  %p2333_p8 = scmp.lt.s32.totalorder %s90_s26, %s90_s26 }
  0x52   :  { %p2334_p9 = scmp.lt.s32.totalorder %s2332_s7, %s2328_s0 }
  0x54   :  { %p2335_p10 = por %p2334_p9, %p2333_p8 }
  0x56   :  { %p2336_p11 = pnand %p2335_p10, %p2329_p7 }
  0x58   :  { %2339 = shalt.err (!%p2336_p11)
}
  0x59   :  { %92 = dma.hbm_to_vmem [thread:$0]  %s2898_s9, 16, %s90_s26, [#allocation9]  }
  0x5a   :  { %2362 = dma.done.wait [#allocation3], 256  }
  0x5b   :  { %2363 = vsyncadd [#allocation3], 4294967040 }
  0x5c   :  { %2364 = dma.done.wait [#allocation6], 272  }
  0x5d   :  { %2365 = vsyncadd [#allocation6], 4294967024 }
  0x5e   :  { %2366 = dma.done.wait [#allocation9], 272  }
  0x5f   :  { %2367 = vsyncadd [#allocation9], 4294967024  ;;  %v2377_v0 = vmov 0.0   ;;  %vm2378_vm0 = vmmov 0   ;;  %s2914_s20 = sld [smem:[#allocation18_spill]]  ;;  %s2915_s25 = sld [smem:[#allocation16_spill]] }
  0x60   :  { %1975 = vmatprep.subr.bf16.mxu1 %v2377_v0  ;;  %1979 = vmatprep.mubr.msk.bf16.mxu1 %vm2378_vm0, %v2377_v0  ;;  %vm187_vm1 = vcmask 261120   ;;  %v2180_v6 = vld [vmem:[#allocation2] sm:$0xff]   ;;  %v2181_v7 = vld [vmem:[#allocation2 + $0x8] sm:$0xff]   ;;  %s2916_s4 = sld [smem:[#allocation17_spill]]  ;;  %vm356_vm2 = vcmask 64512   ;;  %v2182_v28 = vld [vmem:[#allocation5] sm:$0xff]  }
  0x61   :  { %1991 = vmatprep.subr.bf16.mxu0 %v2377_v0  ;;  %1995 = vmatprep.mubr.msk.bf16.mxu0 %vm2378_vm0, %v2377_v0  ;;  %v1859_v11 = vld [vmem:[%s2894_s5] ss:$0 sm:$0xff]  ;;  %s2379_s5 = smov 120   ;;  %v2183_v29 = vld [vmem:[#allocation5 + $0x8] sm:$0xff]   ;;  %vm418_vm3 = vcmask 1043456   ;;  %s2381_s19 = smov 104  }
  0x62   :  { %v1863_v19 = vld [vmem:[%s2895_s6] ss:$0 sm:$0xff]  ;;  %1992 = vmatpush3.bf16.msra.mxu0 %v2182_v28  ;;  %s2380_s6 = smov 112   ;;  %vm1749_vm4 = vcmask 523264   ;;  %s2382_s29 = smov [#allocation11]  }
  0x63   :  { %1993 = vmatprep.subr.bf16.mxu0 %v2377_v0  ;;  %v1867_v46 = vld [vmem:[#allocation7] ss:$0 sm:$0xff] }
  0x65   :  { %v2178_v1 = vld [vmem:[%s2914_s20] sm:$0xff]   ;;  %v2179_v2 = vld [vmem:[%s2914_s20 + $0x8] sm:$0xff]  }
  0x66   :  { %1976 = vmatpush3.bf16.msra.mxu1 %v2178_v1  ;;  %v2571_v3 = vld [vmem:[%s2915_s25] sm:$0xff]  ;;  %v2576_v4 = vld [vmem:[%s2915_s25 + $0x8] sm:$0xff]  ;;  %1994 = vmatpush3.bf16.msra.mxu0 %v2183_v29 }
  0x67   :  { %1977 = vmatprep.subr.bf16.mxu1 %v2377_v0  ;;  %v129_v5 = vpack.c.bf16 %v2576_v4, %v2571_v3  ;;  %v127_v8 = vld [vmem:[%s2916_s4] sm:$0xff]  ;;  %v128_v9 = vld [vmem:[%s2916_s4 + $0x8] sm:$0xff]  ;;  %2005 = vmatprep.subr.bf16.mxu0 %v2377_v0 }
  0x68   :  { %v130_v10 = vpack.c.bf16 %v128_v9, %v127_v8 }
  0x6a   :  { %1978 = vmatpush3.bf16.msra.mxu1 %v2179_v2  ;;  %1996 = vmatmul.mubr.msk.bf16.vlgmr.msra.gmra.mrb[0].mxu0 %vm187_vm1, %v130_v10 }
  0x6b   :  { %1983 = vmatprep.subr.bf16.mxu1 %v2377_v0  ;;  %2007 = vmatprep.mubr.msk.bf16.mxu0 %vm2378_vm0, %v2377_v0 }
  0x6d   :  { %1980 = vmatmul.mubr.msk.bf16.vlgmr.msra.gmra.mrb[0].mxu1 %vm187_vm1, %v129_v5  ;;  %v144_v5 = vld [vmem:[#allocation8 + $0x4] sm:$0xf] }
  0x6e   :  { %1984 = vmatpush3.bf16.msra.mxu1 %v2180_v6  ;;  %1987 = vmatprep.mubr.msk.bf16.mxu1 %vm2378_vm0, %v2377_v0  ;;  %v2648_v6 = vsel %vm418_vm3, %v144_v5, 0 }
  0x6f   :  { %1985 = vmatprep.subr.bf16.mxu1 %v2377_v0 }
  0x72   :  { %1986 = vmatpush3.bf16.msra.mxu1 %v2181_v7 }
  0x73   :  { %1999 = vmatprep.subr.bf16.mxu1 %v2377_v0 }
  0x75   :  { %1988 = vmatmul.mubr.msk.bf16.vlgmr.msra.gmra.mrb[4].mxu1 %vm187_vm1, %v130_v10 }
  0x76   :  { %2001 = vmatprep.mubr.msk.bf16.mxu1 %vm2378_vm0, %v2377_v0 }
 0x13d   :  { %v346_v47 = vpop.f32.mrb[0].mxu0 }
 0x13e   :  { %v347_v48 = vadd.f32 %v1867_v46, %v346_v47  ;;  %v1997_v49 = vpop.f32.mrb[1].mxu0 }
 0x13f   :  { %v349_v50 = vpop.f32.mrb[2].mxu0 }
 0x140   :  { %v225_v12 = vpop.f32.mrb[0].mxu1  ;;  %v350_v51 = vadd.f32 %v1867_v46, %v349_v50  ;;  %v1998_v52 = vpop.f32.mrb[3].mxu0 }
 0x141   :  { %v1981_v13 = vpop.f32.mrb[1].mxu1  ;;  %v226_v15 = vadd.f32 %v1859_v11, %v225_v12 }
 0x142   :  { %v228_v14 = vpop.f32.mrb[2].mxu1  ;;  %v2629_v53 = vpack.c.bf16 %v350_v51, %v347_v48 }
 0x143   :  { %v229_v16 = vadd.f32 %v1859_v11, %v228_v14  ;;  %v1982_v17 = vpop.f32.mrb[3].mxu1  ;;  %v143_v11 = vld [vmem:[#allocation8] sm:$0xf] }
 0x144   :  { %v420_v56 = vsel %vm418_vm3, %v2629_v53, 0  ;;  %v2655_v14 = vsel %vm418_vm3, %v143_v11, 0 }
 0x145   :  { %v2599_v18 = vpack.c.bf16 %v229_v16, %v226_v15  ;;  %2006 = vmatpush3.bf16.msra.mxu0 %v420_v56 }
 0x146   :  { %2017 = vmatprep.subr.bf16.mxu0 %v2377_v0 }
 0x148   :  { %v287_v20 = vpop.f32.mrb[4].mxu1 }
 0x149   :  { %v1989_v21 = vpop.f32.mrb[5].mxu1  ;;  %v288_v23 = vadd.f32 %v1863_v19, %v287_v20 }
 0x14a   :  { %v290_v22 = vpop.f32.mrb[6].mxu1 }
 0x14b   :  { %v291_v24 = vadd.f32 %v1863_v19, %v290_v22  ;;  %v1990_v25 = vpop.f32.mrb[7].mxu1 }
 0x14d   :  { %v2604_v26 = vpack.c.bf16 %v291_v24, %v288_v23 }
 0x14f   :  { %467 = vrot.lane.b32.xlu0 %v2604_v26, %s2379_s5  ;;  %v361_v27 = vsel %vm356_vm2, %v2604_v26, 0 }
 0x150   :  { %2000 = vmatpush3.bf16.xpose.msra.mxu1 %v361_v27 }
 0x151   :  { %2011 = vmatprep.subr.bf16.mxu1 %v2377_v0 }
 0x153   :  { %464 = vrot.lane.b32.xlu0 %v2599_v18, %s2379_s5 }
 0x157   :  { %2002 = vmatmul.mubr.msk.bf16.vlgmr.msra.gmra.mrb[8].mxu1 %vm356_vm2, %v2599_v18 }
 0x158   :  { %2013 = vmatprep.mubr.msk.bf16.mxu1 %vm2378_vm0, %v2377_v0 }
 0x1c1   :  { %v468_v30 = vpop.permute.xlu0 %467 }
 0x1c2   :  { %v473_v31 = vsel %vm356_vm2, %v468_v30, 0 }
 0x1c3   :  { %2012 = vmatpush3.bf16.xpose.msra.mxu1 %v473_v31 }
 0x1c4   :  { %2023 = vmatprep.subr.bf16.mxu1 %v2377_v0 }
 0x1c5   :  { %v465_v32 = vpop.permute.xlu0 %464 }
 0x1ca   :  { %2014 = vmatmul.mubr.msk.bf16.vlgmr.msra.gmra.mrb[12].mxu1 %vm356_vm2, %v465_v32 }
 0x1cb   :  { %2025 = vmatprep.mubr.msk.bf16.mxu1 %vm2378_vm0, %v2377_v0  ;;  %2024 = vmatpush3.bf16.msra.mxu1 %v2648_v6 }
 0x1cc   :  { %2035 = vmatprep.subr.bf16.mxu1 %v2377_v0 }
 0x22a   :  { %v397_v33 = vpop.f32.mrb[8].mxu1 }
 0x22b   :  { %v2003_v34 = vpop.f32.mrb[9].mxu1  ;;  %v403_v35 = vsel %vm356_vm2, %v397_v33, -inf }
 0x22c   :  { %404 = vmax.xlane.f32.xlu1 %v403_v35  ;;  %v400_v36 = vpop.f32.mrb[10].mxu1 }
 0x22d   :  { %v2004_v37 = vpop.f32.mrb[11].mxu1 }
 0x29d   :  { %v509_v38 = vpop.f32.mrb[12].mxu1 }
 0x29e   :  { %v2015_v39 = vpop.f32.mrb[13].mxu1  ;;  %v515_v40 = vsel %vm356_vm2, %v509_v38, -inf }
 0x29f   :  { %516 = vmax.xlane.f32.xlu1 %v515_v40  ;;  %v512_v41 = vpop.f32.mrb[14].mxu1 }
 0x2a0   :  { %v2016_v42 = vpop.f32.mrb[15].mxu1 }
 0x2b9   :  { %v405_v43 = vpop.xlane.xlu1 %404 }
 0x2ba   :  { %v406_v44 = vsub.f32 %v397_v33, %v405_v43 }
 0x2bc   :  { %v407_v45 = vmul.f32 1.442695, %v406_v44 }
 0x2be   :  { %2190 = vpow2.f32 %v407_v45 }
 0x2c8   :  { %v2191_v54 = vpop.eup %2190 }
 0x2c9   :  { %v409_v55 = vsel %vm356_vm2, %v2191_v54, 0.0 }
 0x2ca   :  { %410 = vadd.xlane.f32.xlu0 %v409_v55 }
 0x2e0   :  { %731 = vrot.lane.b32.xlu0 %v2629_v53, %s2380_s6 }
 0x32c   :  { %v517_v57 = vpop.xlane.xlu1 %516 }
 0x32d   :  { %v518_v58 = vsub.f32 %v509_v38, %v517_v57 }
 0x32f   :  { %v519_v59 = vmul.f32 1.442695, %v518_v58 }
 0x331   :  { %2192 = vpow2.f32 %v519_v59  ;;  %v145_v59 = vld [vmem:[#allocation8 + $0x8] sm:$0xf] }
 0x33b   :  { %v2193_v60 = vpop.eup %2192 }
 0x33c   :  { %v521_v61 = vsel %vm356_vm2, %v2193_v60, 0.0 }
 0x33d   :  { %522 = vadd.xlane.f32.xlu1 %v521_v61 }
 0x34e   :  { %528 = vrot.lane.b32.xlu1 %v2629_v53, %s2379_s5 }
 0x352   :  { %671 = vrot.lane.b32.xlu1 %v2604_v26, %s2380_s6 }
 0x356   :  { %669 = vrot.lane.b32.xlu1 %v2599_v18, %s2380_s6 }
 0x357   :  { %v411_v62 = vpop.xlane.xlu0 %410 }
 0x358   :  { %2194 = vrcp.f32 %v411_v62 }
 0x35b   :  { %v732_v15 = vpop.permute.xlu0 %731 }
 0x35c   :  { %v737_v21 = vsel %vm418_vm3, %v732_v15, 0 }
 0x362   :  { %v2195_v63 = vpop.eup %2194 }
 0x363   :  { %v413_v1 = vmul.f32 %v2195_v63, %v2191_v54 }
 0x365   :  { %v414_v2 = vpack.c.bf16 %v413_v1, %v413_v1 }
 0x367   :  { %2008 = vmatmul.mubr.msk.bf16.vlgmr.msra.gmra.mrb[4].mxu0 %vm356_vm2, %v414_v2 }
 0x368   :  { %2019 = vmatprep.mubr.msk.bf16.mxu0 %vm2378_vm0, %v2377_v0 }
 0x3ca   :  { %v523_v7 = vpop.xlane.xlu1 %522 }
 0x3cb   :  { %2196 = vrcp.f32 %v523_v7 }
 0x3ce   :  { %v529_v8 = vpop.permute.xlu1 %528 }
 0x3cf   :  { %v534_v9 = vsel %vm418_vm3, %v529_v8, 0 }
 0x3d0   :  { %2018 = vmatpush3.bf16.msra.mxu0 %v534_v9 }
 0x3d1   :  { %2029 = vmatprep.subr.bf16.mxu0 %v2377_v0 }
 0x3d2   :  { %v672_v23 = vpop.permute.xlu1 %671 }
 0x3d3   :  { %v677_v29 = vsel %vm356_vm2, %v672_v23, 0 }
 0x3d5   :  { %v2197_v10 = vpop.eup %2196 }
 0x3d6   :  { %v525_v12 = vmul.f32 %v2197_v10, %v2193_v60  ;;  %v670_v31 = vpop.permute.xlu1 %669  ;;  %v2692_v60 = vsel %vm418_vm3, %v145_v59, 0 }
 0x3d8   :  { %v526_v13 = vpack.c.bf16 %v525_v12, %v525_v12 }
 0x3da   :  { %2020 = vmatmul.mubr.msk.bf16.vlgmr.msra.gmra.mrb[8].mxu0 %vm356_vm2, %v526_v13 }
 0x3db   :  { %2030 = vmatpush3.bf16.msra.mxu0 %v2655_v14  ;;  %2031 = vmatprep.mubr.msk.bf16.mxu0 %vm2378_vm0, %v2377_v0 }
 0x3dc   :  { %2041 = vmatprep.subr.bf16.mxu0 %v2377_v0 }
 0x43a   :  { %v456_v16 = vpop.f32.mrb[4].mxu0 }
 0x43b   :  { %v462_v17 = vpack.c.bf16 %v456_v16, %v456_v16  ;;  %v2009_v19 = vpop.f32.mrb[5].mxu0 }
 0x43c   :  { %v459_v20 = vpop.f32.mrb[6].mxu0  ;;  %v2709_v19 = vrot.slane %v2599_v18, 4 }
 0x43d   :  { %v2010_v22 = vpop.f32.mrb[7].mxu0  ;;  %2032 = vmatmul.mubr.msk.bf16.vlgmr.msra.gmra.mrb[12].mxu0 %vm356_vm2, %v462_v17  ;;  %v2704_v17 = vrot.slane %v2604_v26, 4  ;;  %v146_v20 = vld [vmem:[#allocation8 + $0xc] sm:$0xf] }
 0x43e   :  { %2042 = vmatpush3.bf16.msra.mxu0 %v737_v21  ;;  %2043 = vmatprep.mubr.msk.bf16.mxu0 %vm2378_vm0, %v2377_v0  ;;  %v2714_v22 = vsel %vm418_vm3, %v146_v20, 0 }
 0x43f   :  { %2053 = vmatprep.subr.bf16.mxu0 %v2377_v0 }
 0x4ad   :  { %v570_v24 = vpop.f32.mrb[8].mxu0 }
 0x4ae   :  { %v576_v25 = vpack.c.bf16 %v570_v24, %v570_v24  ;;  %v2021_v27 = vpop.f32.mrb[9].mxu0 }
 0x4af   :  { %v573_v28 = vpop.f32.mrb[10].mxu0 }
 0x4b0   :  { %v2022_v30 = vpop.f32.mrb[11].mxu0  ;;  %2026 = vmatmul.mubr.msk.bf16.vlgmr.msra.gmra.mrb[16].mxu1 %vm356_vm2, %v576_v25 }
 0x4b1   :  { %2036 = vmatpush3.bf16.xpose.msra.mxu1 %v677_v29  ;;  %2037 = vmatprep.mubr.msk.bf16.mxu1 %vm2378_vm0, %v2377_v0 }
 0x4b2   :  { %2047 = vmatprep.subr.bf16.mxu1 %v2377_v0 }
 0x4b8   :  { %2038 = vmatmul.mubr.msk.bf16.vlgmr.msra.gmra.mrb[20].mxu1 %vm356_vm2, %v670_v31 }
 0x4b9   :  { %2049 = vmatprep.mubr.msk.bf16.mxu1 %vm2378_vm0, %v2377_v0  ;;  %2048 = vmatpush3.bf16.msra.mxu1 %v2692_v60 }
 0x4ba   :  { %2059 = vmatprep.subr.bf16.mxu1 %v2377_v0 }
 0x510   :  { %v663_v32 = vpop.f32.mrb[12].mxu0 }
 0x511   :  { %v2033_v33 = vpop.f32.mrb[13].mxu0 }
 0x512   :  { %v666_v34 = vpop.f32.mrb[14].mxu0 }
 0x513   :  { %v2034_v35 = vpop.f32.mrb[15].mxu0 }
 0x583   :  { %v617_v36 = vpop.f32.mrb[16].mxu1 }
 0x584   :  { %v2675_v37 = vadd.f32 %v663_v32, %v617_v36  ;;  %v2027_v38 = vpop.f32.mrb[17].mxu1  ;;  %v991_v32 = vsel %vm356_vm2, %v2704_v17, 0  ;;  %v2741_v36 = vrot.slane %v2629_v53, 4 }
 0x585   :  { %v620_v39 = vpop.f32.mrb[18].mxu1 }
 0x586   :  { %v2028_v40 = vpop.f32.mrb[19].mxu1 }
 0x58b   :  { %v713_v41 = vpop.f32.mrb[20].mxu1 }
 0x58c   :  { %v2039_v42 = vpop.f32.mrb[21].mxu1  ;;  %v719_v43 = vsel %vm356_vm2, %v713_v41, -inf }
 0x58d   :  { %720 = vmax.xlane.f32.xlu1 %v719_v43  ;;  %v716_v44 = vpop.f32.mrb[22].mxu1  ;;  %v1050_v42 = vsel %vm418_vm3, %v2741_v36, 0 }
 0x58e   :  { %v2040_v45 = vpop.f32.mrb[23].mxu1 }
 0x61a   :  { %v721_v46 = vpop.xlane.xlu1 %720 }
 0x61b   :  { %v722_v47 = vsub.f32 %v713_v41, %v721_v46 }
 0x61d   :  { %v723_v48 = vmul.f32 1.442695, %v722_v47 }
 0x61f   :  { %2198 = vpow2.f32 %v723_v48 }
 0x629   :  { %v2199_v49 = vpop.eup %2198 }
 0x62a   :  { %v725_v50 = vsel %vm356_vm2, %v2199_v49, 0.0 }
 0x62b   :  { %726 = vadd.xlane.f32.xlu0 %v725_v50 }
 0x641   :  { %829 = vrot.lane.b32.xlu0 %v2604_v26, %s2381_s19 }
 0x645   :  { %827 = vrot.lane.b32.xlu0 %v2599_v18, %s2381_s19 }
 0x6b8   :  { %v727_v51 = vpop.xlane.xlu0 %726 }
 0x6b9   :  { %2200 = vrcp.f32 %v727_v51 }
 0x6bc   :  { %v830_v55 = vpop.permute.xlu0 %829 }
 0x6bd   :  { %v835_v57 = vsel %vm356_vm2, %v830_v55, 0 }
 0x6c0   :  { %v828_v58 = vpop.permute.xlu0 %827 }
 0x6c3   :  { %v2201_v52 = vpop.eup %2200 }
 0x6c4   :  { %v729_v54 = vmul.f32 %v2201_v52, %v2199_v49 }
 0x6c6   :  { %v730_v56 = vpack.c.bf16 %v729_v54, %v729_v54 }
 0x6c8   :  { %2044 = vmatmul.mubr.msk.bf16.vlgmr.msra.gmra.mrb[16].mxu0 %vm356_vm2, %v730_v56 }
 0x6c9   :  { %2054 = vmatpush3.bf16.xpose.msra.mxu0 %v835_v57  ;;  %2055 = vmatprep.mubr.msk.bf16.mxu0 %vm2378_vm0, %v2377_v0 }
 0x6ca   :  { %2065 = vmatprep.subr.bf16.mxu0 %v2377_v0 }
 0x6d0   :  { %2056 = vmatmul.mubr.msk.bf16.vlgmr.msra.gmra.mrb[20].mxu0 %vm356_vm2, %v828_v58 }
 0x6d1   :  { %2067 = vmatprep.mubr.msk.bf16.mxu0 %vm2378_vm0, %v2377_v0  ;;  %2066 = vmatpush3.bf16.msra.mxu0 %v2714_v22 }
 0x6d2   :  { %2077 = vmatprep.subr.bf16.mxu0 %v2377_v0 }
 0x79b   :  { %v773_v61 = vpop.f32.mrb[16].mxu0 }
 0x79c   :  { %v779_v62 = vpack.c.bf16 %v773_v61, %v773_v61  ;;  %v2045_v63 = vpop.f32.mrb[17].mxu0 }
 0x79d   :  { %v776_v1 = vpop.f32.mrb[18].mxu0 }
 0x79e   :  { %v2046_v2 = vpop.f32.mrb[19].mxu0  ;;  %2050 = vmatmul.mubr.msk.bf16.vlgmr.msra.gmra.mrb[24].mxu1 %vm356_vm2, %v779_v62 }
 0x79f   :  { %2061 = vmatprep.mubr.msk.bf16.mxu1 %vm2378_vm0, %v2377_v0 }
 0x7a3   :  { %v871_v5 = vpop.f32.mrb[20].mxu0 }
 0x7a4   :  { %v2057_v7 = vpop.f32.mrb[21].mxu0  ;;  %v877_v8 = vsel %vm356_vm2, %v871_v5, -inf }
 0x7a5   :  { %878 = vmax.xlane.f32.xlu0 %v877_v8  ;;  %v874_v9 = vpop.f32.mrb[22].mxu0 }
 0x7a6   :  { %v2058_v10 = vpop.f32.mrb[23].mxu0 }
 0x832   :  { %v879_v11 = vpop.xlane.xlu0 %878 }
 0x833   :  { %v880_v12 = vsub.f32 %v871_v5, %v879_v11 }
 0x835   :  { %v881_v13 = vmul.f32 1.442695, %v880_v12 }
 0x837   :  { %2202 = vpow2.f32 %v881_v13 }
 0x841   :  { %v2203_v15 = vpop.eup %2202 }
 0x842   :  { %v883_v16 = vsel %vm356_vm2, %v2203_v15, 0.0 }
 0x843   :  { %884 = vadd.xlane.f32.xlu1 %v883_v16 }
 0x854   :  { %889 = vrot.lane.b32.xlu1 %v2629_v53, %s2381_s19 }
 0x858   :  { %1095 = vrot.lane.b32.xlu1 %v2704_v17, %s2379_s5 }
 0x85c   :  { %1093 = vrot.lane.b32.xlu1 %v2709_v19, %s2379_s5 }
 0x871   :  { %v820_v21 = vpop.f32.mrb[24].mxu1 }
 0x872   :  { %v2717_v23 = vadd.f32 %v820_v21, %v2675_v37  ;;  %v2051_v24 = vpop.f32.mrb[25].mxu1 }
 0x873   :  { %v823_v26 = vpop.f32.mrb[26].mxu1 }
 0x874   :  { %v2052_v25 = vpop.f32.mrb[27].mxu1 }
 0x8d0   :  { %v885_v18 = vpop.xlane.xlu1 %884 }
 0x8d1   :  { %2204 = vrcp.f32 %v885_v18 }
 0x8d4   :  { %v890_v27 = vpop.permute.xlu1 %889 }
 0x8d5   :  { %v895_v28 = vsel %vm418_vm3, %v890_v27, 0 }
 0x8d6   :  { %2060 = vmatpush3.bf16.msra.mxu1 %v895_v28 }
 0x8d7   :  { %2071 = vmatprep.subr.bf16.mxu1 %v2377_v0 }
 0x8d8   :  { %v1096_v33 = vpop.permute.xlu1 %1095 }
 0x8d9   :  { %v1101_v34 = vsel %vm356_vm2, %v1096_v33, 0 }
 0x8db   :  { %v2205_v29 = vpop.eup %2204 }
 0x8dc   :  { %v887_v30 = vmul.f32 %v2205_v29, %v2203_v15  ;;  %v1094_v35 = vpop.permute.xlu1 %1093 }
 0x8de   :  { %v888_v31 = vpack.c.bf16 %v887_v30, %v887_v30 }
 0x8e0   :  { %2062 = vmatmul.mubr.msk.bf16.vlgmr.msra.gmra.mrb[28].mxu1 %vm356_vm2, %v888_v31 }
 0x8e1   :  { %2072 = vmatpush3.bf16.xpose.msra.mxu1 %v991_v32  ;;  %2073 = vmatprep.mubr.msk.bf16.mxu1 %vm2378_vm0, %v2377_v0 }
 0x8e2   :  { %2083 = vmatprep.subr.bf16.mxu1 %v2377_v0 }
 0x8e8   :  { %2074 = vmatmul.mubr.msk.bf16.vlgmr.msra.gmra.mrb[32].mxu1 %vm356_vm2, %v2709_v19 }
 0x8e9   :  { %2084 = vmatpush3.bf16.xpose.msra.mxu1 %v1101_v34  ;;  %2085 = vmatprep.mubr.msk.bf16.mxu1 %vm2378_vm0, %v2377_v0 }
 0x8ea   :  { %2095 = vmatprep.subr.bf16.mxu1 %v2377_v0 }
 0x8f0   :  { %2086 = vmatmul.mubr.msk.bf16.vlgmr.msra.gmra.mrb[36].mxu1 %vm356_vm2, %v1094_v35 }
 0x8f1   :  { %2096 = vmatpush3.bf16.msra.mxu1 %v2648_v6  ;;  %2097 = vmatprep.mubr.msk.bf16.mxu1 %vm2378_vm0, %v2377_v0 }
 0x8f2   :  { %2107 = vmatprep.subr.bf16.mxu1 %v2377_v0 }
 0x9b3   :  { %v931_v37 = vpop.f32.mrb[28].mxu1 }
 0x9b4   :  { %v937_v38 = vpack.c.bf16 %v931_v37, %v931_v37  ;;  %v2063_v39 = vpop.f32.mrb[29].mxu1 }
 0x9b5   :  { %v934_v40 = vpop.f32.mrb[30].mxu1 }
 0x9b6   :  { %v2064_v41 = vpop.f32.mrb[31].mxu1  ;;  %2068 = vmatmul.mubr.msk.bf16.vlgmr.msra.gmra.mrb[24].mxu0 %vm356_vm2, %v937_v38 }
 0x9b7   :  { %2078 = vmatpush3.bf16.msra.mxu0 %v1050_v42  ;;  %2079 = vmatprep.mubr.msk.bf16.mxu0 %vm2378_vm0, %v2377_v0 }
 0x9b8   :  { %2089 = vmatprep.subr.bf16.mxu0 %v2377_v0 }
 0x9bb   :  { %v1027_v6 = vpop.f32.mrb[32].mxu1 }
 0x9bc   :  { %v2075_v43 = vpop.f32.mrb[33].mxu1  ;;  %v1033_v53 = vsel %vm356_vm2, %v1027_v6, -inf }
 0x9bd   :  { %1034 = vmax.xlane.f32.xlu1 %v1033_v53  ;;  %v1030_v44 = vpop.f32.mrb[34].mxu1 }
 0x9be   :  { %v2076_v45 = vpop.f32.mrb[35].mxu1 }
 0x9c3   :  { %v1137_v46 = vpop.f32.mrb[36].mxu1 }
 0x9c4   :  { %v2087_v47 = vpop.f32.mrb[37].mxu1  ;;  %v1143_v48 = vsel %vm356_vm2, %v1137_v46, -inf }
 0x9c5   :  { %1144 = vmax.xlane.f32.xlu0 %v1143_v48  ;;  %v1140_v49 = vpop.f32.mrb[38].mxu1 }
 0x9c6   :  { %v2088_v50 = vpop.f32.mrb[39].mxu1 }
 0x9ce   :  { %1290 = vrot.lane.b32.xlu1 %v2709_v19, %s2380_s6 }
 0xa4a   :  { %v1035_v51 = vpop.xlane.xlu1 %1034 }
 0xa4b   :  { %v1036_v52 = vsub.f32 %v1027_v6, %v1035_v51 }
 0xa4d   :  { %v1037_v54 = vmul.f32 1.442695, %v1036_v52 }
 0xa4e   :  { %v1291_v33 = vpop.permute.xlu1 %1290 }
 0xa4f   :  { %2206 = vpow2.f32 %v1037_v54 }
 0xa52   :  { %v1145_v55 = vpop.xlane.xlu0 %1144 }
 0xa53   :  { %v1146_v56 = vsub.f32 %v1137_v46, %v1145_v55 }
 0xa55   :  { %v1147_v57 = vmul.f32 1.442695, %v1146_v56 }
 0xa57   :  { %2208 = vpow2.f32 %v1147_v57 }
 0xa59   :  { %v2207_v58 = vpop.eup %2206 }
 0xa5a   :  { %v1039_v59 = vsel %vm356_vm2, %v2207_v58, 0.0 }
 0xa5b   :  { %1040 = vadd.xlane.f32.xlu0 %v1039_v59 }
 0xa61   :  { %v2209_v61 = vpop.eup %2208 }
 0xa62   :  { %v1149_v62 = vsel %vm356_vm2, %v2209_v61, 0.0 }
 0xa63   :  { %1150 = vadd.xlane.f32.xlu0 %v1149_v62 }
 0xa79   :  { %1155 = vrot.lane.b32.xlu0 %v2741_v36, %s2379_s5  ;;  %s1845_s5 = sshll.u32 %s2382_s29, 4  ;;  %s1846_s5 = int_to_ptr.vmem [resolvable:$true] %s1845_s5 }
 0xa7a   :  { %p2345_p13 = scmp.lt.s32.totalorder %s1846_s5, %s1846_s5 }
 0xa7d   :  { %1292 = vrot.lane.b32.xlu0 %v2704_v17, %s2380_s6 }
 0xa89   :  { %v978_v63 = vpop.f32.mrb[24].mxu0 }
 0xa8a   :  { %v2760_v1 = vadd.f32 %v978_v63, %v2717_v23  ;;  %v2069_v2 = vpop.f32.mrb[25].mxu0 }
 0xa8b   :  { %v981_v5 = vpop.f32.mrb[26].mxu0 }
 0xa8c   :  { %v2070_v7 = vpop.f32.mrb[27].mxu0 }
 0xae8   :  { %v1041_v8 = vpop.xlane.xlu0 %1040 }
 0xae9   :  { %2210 = vrcp.f32 %v1041_v8 }
 0xaf0   :  { %v1151_v9 = vpop.xlane.xlu0 %1150 }
 0xaf1   :  { %2212 = vrcp.f32 %v1151_v9 }
 0xaf3   :  { %v2211_v10 = vpop.eup %2210 }
 0xaf4   :  { %v1043_v11 = vmul.f32 %v2211_v10, %v2207_v58  ;;  %v1156_v12 = vpop.permute.xlu0 %1155 }
 0xaf5   :  { %v1161_v15 = vsel %vm418_vm3, %v1156_v12, 0 }
 0xaf6   :  { %v1044_v13 = vpack.c.bf16 %v1043_v11, %v1043_v11 }
 0xaf8   :  { %2080 = vmatmul.mubr.msk.bf16.vlgmr.msra.gmra.mrb[28].mxu0 %vm356_vm2, %v1044_v13  ;;  %v1293_v27 = vpop.permute.xlu0 %1292 }
 0xaf9   :  { %2090 = vmatpush3.bf16.msra.mxu0 %v1161_v15  ;;  %2091 = vmatprep.mubr.msk.bf16.mxu0 %vm2378_vm0, %v2377_v0  ;;  %v1298_v31 = vsel %vm356_vm2, %v1293_v27, 0 }
 0xafa   :  { %2101 = vmatprep.subr.bf16.mxu0 %v2377_v0 }
 0xafb   :  { %v2213_v16 = vpop.eup %2212 }
 0xafc   :  { %v1153_v20 = vmul.f32 %v2213_v16, %v2209_v61  ;;  %v1895_v16 = vld [vmem:[#allocation10] ss:$0 sm:$0xff] }
 0xafe   :  { %v1154_v21 = vpack.c.bf16 %v1153_v20, %v1153_v20  ;;  %v1606_v20 = vadd.f32 %v1895_v16, %v2760_v1 }
 0xb00   :  { %2092 = vmatmul.mubr.msk.bf16.vlgmr.msra.gmra.mrb[32].mxu0 %vm356_vm2, %v1154_v21 }
 0xb01   :  { %2102 = vmatpush3.bf16.msra.mxu0 %v2655_v14  ;;  %2103 = vmatprep.mubr.msk.bf16.mxu0 %vm2378_vm0, %v2377_v0 }
 0xb02   :  { %2113 = vmatprep.subr.bf16.mxu0 %v2377_v0 }
 0xbcb   :  { %v1086_v23 = vpop.f32.mrb[28].mxu0 }
 0xbcc   :  { %v1092_v24 = vpack.c.bf16 %v1086_v23, %v1086_v23  ;;  %v2081_v26 = vpop.f32.mrb[29].mxu0 }
 0xbcd   :  { %v1089_v25 = vpop.f32.mrb[30].mxu0 }
 0xbce   :  { %v2082_v18 = vpop.f32.mrb[31].mxu0  ;;  %2104 = vmatmul.mubr.msk.bf16.vlgmr.msra.gmra.mrb[36].mxu0 %vm356_vm2, %v1092_v24  ;;  %v1608_v24 = vadd.f32 %v1606_v20, %v2571_v3 }
 0xbcf   :  { %2115 = vmatprep.mubr.msk.bf16.mxu0 %vm2378_vm0, %v2377_v0 }
 0xbd3   :  { %v1197_v28 = vpop.f32.mrb[32].mxu0 }
 0xbd4   :  { %v1203_v29 = vpack.c.bf16 %v1197_v28, %v1197_v28  ;;  %v2093_v30 = vpop.f32.mrb[33].mxu0 }
 0xbd5   :  { %v1200_v14 = vpop.f32.mrb[34].mxu0 }
 0xbd6   :  { %v2094_v32 = vpop.f32.mrb[35].mxu0  ;;  %2098 = vmatmul.mubr.msk.bf16.vlgmr.msra.gmra.mrb[40].mxu1 %vm356_vm2, %v1203_v29 }
 0xbd7   :  { %2108 = vmatpush3.bf16.xpose.msra.mxu1 %v1298_v31  ;;  %2109 = vmatprep.mubr.msk.bf16.mxu1 %vm2378_vm0, %v2377_v0 }
 0xbd8   :  { %2119 = vmatprep.subr.bf16.mxu1 %v2377_v0 }
 0xbde   :  { %2110 = vmatmul.mubr.msk.bf16.vlgmr.msra.gmra.mrb[44].mxu1 %vm356_vm2, %v1291_v33 }
 0xbdf   :  { %2120 = vmatpush3.bf16.msra.mxu1 %v2692_v60  ;;  %2121 = vmatprep.mubr.msk.bf16.mxu1 %vm2378_vm0, %v2377_v0 }
 0xbe0   :  { %2131 = vmatprep.subr.bf16.mxu1 %v2377_v0 }
 0xca1   :  { %v1284_v34 = vpop.f32.mrb[36].mxu0 }
 0xca2   :  { %v2105_v35 = vpop.f32.mrb[37].mxu0 }
 0xca3   :  { %v1287_v37 = vpop.f32.mrb[38].mxu0 }
 0xca4   :  { %v2106_v38 = vpop.f32.mrb[39].mxu0 }
 0xca9   :  { %v1241_v39 = vpop.f32.mrb[40].mxu1 }
 0xcaa   :  { %v2785_v40 = vadd.f32 %v1284_v34, %v1241_v39  ;;  %v2099_v41 = vpop.f32.mrb[41].mxu1 }
 0xcab   :  { %v1244_v42 = vpop.f32.mrb[42].mxu1 }
 0xcac   :  { %v2100_v6 = vpop.f32.mrb[43].mxu1 }
 0xcb1   :  { %v1334_v43 = vpop.f32.mrb[44].mxu1 }
 0xcb2   :  { %v2111_v53 = vpop.f32.mrb[45].mxu1  ;;  %v1340_v44 = vsel %vm356_vm2, %v1334_v43, -inf }
 0xcb3   :  { %1341 = vmax.xlane.f32.xlu0 %v1340_v44  ;;  %v1337_v60 = vpop.f32.mrb[46].mxu1 }
 0xcb4   :  { %v2112_v45 = vpop.f32.mrb[47].mxu1 }
 0xcc9   :  { %1352 = vrot.lane.b32.xlu0 %v2741_v36, %s2380_s6  ;;  %s2340_s6 = scalar_lea.vmem %s1846_s5, 256 }
 0xcca   :  { %p2341_p12 = scmp.ne.s32.totalorder %s1846_s5, %s2340_s6  ;;  %p2346_p0 = scmp.lt.s32.totalorder %s2340_s6, %s2340_s6 }
 0xccc   :  { %p2347_p1 = por %p2346_p0, %p2345_p13 }
 0xccd   :  { %1445 = vrot.lane.b32.xlu0 %v2709_v19, %s2381_s19 }
 0xcce   :  { %p2348_p2 = pnand %p2347_p1, %p2341_p12 }
 0xd40   :  { %v1342_v46 = vpop.xlane.xlu0 %1341 }
 0xd41   :  { %v1343_v47 = vsub.f32 %v1334_v43, %v1342_v46 }
 0xd43   :  { %v1344_v48 = vmul.f32 1.442695, %v1343_v47 }
 0xd44   :  { %v1353_v49 = vpop.permute.xlu0 %1352 }
 0xd45   :  { %2214 = vpow2.f32 %v1344_v48  ;;  %v1358_v50 = vsel %vm418_vm3, %v1353_v49, 0 }
 0xd46   :  { %2114 = vmatpush3.bf16.msra.mxu0 %v1358_v50 }
 0xd47   :  { %2125 = vmatprep.subr.bf16.mxu0 %v2377_v0 }
 0xd48   :  { %v1446_v59 = vpop.permute.xlu0 %1445 }
 0xd4f   :  { %v2215_v51 = vpop.eup %2214 }
 0xd50   :  { %v1346_v52 = vsel %vm356_vm2, %v2215_v51, 0.0 }
 0xd51   :  { %1347 = vadd.xlane.f32.xlu1 %v1346_v52  ;;  %v2185_v52 = vld [vmem:[%s2899_s10 + $0x8] sm:$0xff]  }
 0xd62   :  { %1447 = vrot.lane.b32.xlu1 %v2704_v17, %s2381_s19 }
 0xdde   :  { %v1348_v54 = vpop.xlane.xlu1 %1347 }
 0xddf   :  { %2216 = vrcp.f32 %v1348_v54  ;;  %v2187_v54 = vld [vmem:[%s2901_s12 + $0x8] sm:$0xff]  }
 0xde2   :  { %v1448_v56 = vpop.permute.xlu1 %1447 }
 0xde3   :  { %v1453_v58 = vsel %vm356_vm2, %v1448_v56, 0 }
 0xde9   :  { %v2217_v19 = vpop.eup %2216 }
 0xdea   :  { %v1350_v55 = vmul.f32 %v2217_v19, %v2215_v51  ;;  %v2184_v51 = vld [vmem:[%s2899_s10] sm:$0xff]  }
 0xdec   :  { %v1351_v57 = vpack.c.bf16 %v1350_v55, %v1350_v55 }
 0xdee   :  { %2116 = vmatmul.mubr.msk.bf16.vlgmr.msra.gmra.mrb[40].mxu0 %vm356_vm2, %v1351_v57 }
 0xdef   :  { %2126 = vmatpush3.bf16.xpose.msra.mxu0 %v1453_v58  ;;  %2127 = vmatprep.mubr.msk.bf16.mxu0 %vm2378_vm0, %v2377_v0 }
 0xdf0   :  { %2137 = vmatprep.subr.bf16.mxu0 %v2377_v0 }
 0xdf6   :  { %2128 = vmatmul.mubr.msk.bf16.vlgmr.msra.gmra.mrb[44].mxu0 %vm356_vm2, %v1446_v59 }
 0xdf7   :  { %2138 = vmatpush3.bf16.msra.mxu0 %v2714_v22  ;;  %2139 = vmatprep.mubr.msk.bf16.mxu0 %vm2378_vm0, %v2377_v0 }
 0xdf8   :  { %2151 = vmatprep.subr.bf16.mxu0 %v2377_v0 }
 0xec1   :  { %v1394_v17 = vpop.f32.mrb[40].mxu0 }
 0xec2   :  { %v1400_v61 = vpack.c.bf16 %v1394_v17, %v1394_v17  ;;  %v2117_v62 = vpop.f32.mrb[41].mxu0 }
 0xec3   :  { %v1397_v63 = vpop.f32.mrb[42].mxu0  ;;  %v1896_v62 = vld [vmem:[%s2903_s14] ss:$0 sm:$0xff] }
 0xec4   :  { %v2118_v2 = vpop.f32.mrb[43].mxu0  ;;  %2122 = vmatmul.mubr.msk.bf16.vlgmr.msra.gmra.mrb[48].mxu1 %vm356_vm2, %v1400_v61 }
 0xec5   :  { %2133 = vmatprep.mubr.msk.bf16.mxu1 %vm2378_vm0, %v2377_v0 }
 0xec9   :  { %v1489_v5 = vpop.f32.mrb[44].mxu0 }
 0xeca   :  { %v2129_v7 = vpop.f32.mrb[45].mxu0  ;;  %v1495_v8 = vsel %vm356_vm2, %v1489_v5, -inf }
 0xecb   :  { %1496 = vmax.xlane.f32.xlu0 %v1495_v8  ;;  %v1492_v22 = vpop.f32.mrb[46].mxu0  ;;  %v1897_v7 = vld [vmem:[%s2904_s15] ss:$0 sm:$0xff] }
 0xecc   :  { %v2130_v9 = vpop.f32.mrb[47].mxu0 }
 0xee1   :  { %1507 = vrot.lane.b32.xlu0 %v2741_v36, %s2381_s19  ;;  %v1610_v36 = vsel %vm187_vm1, %v1608_v24, 0.0 }
 0xf58   :  { %v1497_v10 = vpop.xlane.xlu0 %1496 }
 0xf59   :  { %v1498_v11 = vsub.f32 %v1489_v5, %v1497_v10 }
 0xf5b   :  { %v1499_v12 = vmul.f32 1.442695, %v1498_v11  ;;  %v2188_v11 = vld [vmem:[%s2901_s12 + $0x10] sm:$0xff]  }
 0xf5c   :  { %v1508_v13 = vpop.permute.xlu0 %1507 }
 0xf5d   :  { %2218 = vpow2.f32 %v1499_v12  ;;  %v1513_v15 = vsel %vm418_vm3, %v1508_v13, 0  ;;  %v2189_v12 = vld [vmem:[%s2901_s12 + $0x18] sm:$0xff]   ;;  %v1898_v13 = vld [vmem:[%s2900_s11] ss:$0 sm:$0xff] }
 0xf5e   :  { %2132 = vmatpush3.bf16.msra.mxu1 %v1513_v15 }
 0xf5f   :  { %2143 = vmatprep.subr.bf16.mxu1 %v2377_v0 }
 0xf67   :  { %v2219_v21 = vpop.eup %2218 }
 0xf68   :  { %v1501_v23 = vsel %vm356_vm2, %v2219_v21, 0.0 }
 0xf69   :  { %1502 = vadd.xlane.f32.xlu1 %v1501_v23 }
 0xf6d   :  { %1611 = vadd.xlane.f32.xlu1 %v1610_v36 }
 0xf97   :  { %v1438_v26 = vpop.f32.mrb[48].mxu1 }
 0xf98   :  { %v1444_v25 = vadd.f32 %v1438_v26, %v2785_v40  ;;  %v2123_v18 = vpop.f32.mrb[49].mxu1 }
 0xf99   :  { %v1441_v27 = vpop.f32.mrb[50].mxu1 }
 0xf9a   :  { %v2124_v28 = vpop.f32.mrb[51].mxu1 }
 0xff6   :  { %v1503_v29 = vpop.xlane.xlu1 %1502 }
 0xff7   :  { %2220 = vrcp.f32 %v1503_v29 }
 0xffa   :  { %v1612_v30 = vpop.xlane.xlu1 %1611 }
 0xffb   :  { %v1617_v14 = vmul.f32 0.03125, %v1612_v30 }
 0xffd   :  { %v1619_v1 = vsub.f32 %v1608_v24, %v1617_v14 }
 0xfff   :  { %v1621_v31 = vmul.f32 %v1619_v1, %v1619_v1 }
0x1001   :  { %v2221_v32 = vpop.eup %2220  ;;  %v1623_v33 = vsel %vm187_vm1, %v1621_v31, 0.0 }
0x1002   :  { %v1505_v3 = vmul.f32 %v2221_v32, %v2219_v21  ;;  %1624 = vadd.xlane.f32.xlu0 %v1623_v33 }
0x1004   :  { %v1506_v34 = vpack.c.bf16 %v1505_v3, %v1505_v3 }
0x1006   :  { %2134 = vmatmul.mubr.msk.bf16.vlgmr.msra.gmra.mrb[52].mxu1 %vm356_vm2, %v1506_v34 }
0x1007   :  { %2147 = vmatprep.mubr.msk.bf16.mxu1 %vm2378_vm0, %v2377_v0  ;;  %2144 = vmatpush3.bf16.msra.mxu1 %v2184_v51 }
0x1008   :  { %2145 = vmatprep.subr.bf16.mxu1 %v2377_v0 }
0x100b   :  { %2146 = vmatpush3.bf16.msra.mxu1 %v2185_v52 }
0x108f   :  { %v1625_v19 = vpop.xlane.xlu0 %1624 }
0x1090   :  { %v1629_v55 = vmul.f32 0.03125, %v1625_v19 }
0x1092   :  { %v1631_v56 = vadd.f32 1e-05, %v1629_v55 }
0x1094   :  { %2222 = vrsqrt.f32 %v1631_v56 }
0x109e   :  { %v2223_v17 = vpop.eup %2222 }
0x109f   :  { %v1635_v61 = vmul.f32 %v2223_v17, %v1619_v1 }
0x10a1   :  { %v1643_v2 = vmul.f32 %v1896_v62, %v1635_v61 }
0x10a3   :  { %v1651_v22 = vadd.f32 %v1897_v7, %v1643_v2 }
0x10d9   :  { %v1549_v35 = vpop.f32.mrb[52].mxu1 }
0x10da   :  { %v1555_v37 = vpack.c.bf16 %v1549_v35, %v1549_v35  ;;  %v2135_v38 = vpop.f32.mrb[53].mxu1 }
0x10db   :  { %v1552_v39 = vpop.f32.mrb[54].mxu1 }
0x10dc   :  { %v2136_v40 = vpop.f32.mrb[55].mxu1  ;;  %2140 = vmatmul.mubr.msk.bf16.vlgmr.msra.gmra.mrb[48].mxu0 %vm356_vm2, %v1555_v37 }
0x10dd   :  { %2159 = vmatprep.mubr.msk.bf16.mxu0 %vm2378_vm0, %v2377_v0 }
0x11af   :  { %v1593_v41 = vpop.f32.mrb[48].mxu0 }
0x11b0   :  { %v1599_v42 = vadd.f32 %v1593_v41, %v1444_v25  ;;  %v2141_v6 = vpop.f32.mrb[49].mxu0 }
0x11b1   :  { %v1596_v43 = vpop.f32.mrb[50].mxu0 }
0x11b2   :  { %v1607_v53 = vadd.f32 %v1895_v16, %v1599_v42  ;;  %v2142_v44 = vpop.f32.mrb[51].mxu0 }
0x11b4   :  { %v1609_v60 = vadd.f32 %v1607_v53, %v2576_v4  ;;  %v2186_v4 = vld [vmem:[%s2901_s12] sm:$0xff]  }
0x11b5   :  { %2152 = vmatpush3.bf16.msra.mxu0 %v2186_v4 }
0x11b6   :  { %v1613_v45 = vsel %vm187_vm1, %v1609_v60, 0.0  ;;  %2153 = vmatprep.subr.bf16.mxu0 %v2377_v0 }
0x11b7   :  { %1614 = vadd.xlane.f32.xlu1 %v1613_v45 }
0x11b9   :  { %2154 = vmatpush3.bf16.msra.mxu0 %v2187_v54 }
0x11ba   :  { %2155 = vmatprep.subr.bf16.mxu0 %v2377_v0 }
0x11bd   :  { %2156 = vmatpush3.bf16.msra.mxu0 %v2188_v11 }
0x11be   :  { %2157 = vmatprep.subr.bf16.mxu0 %v2377_v0  ;;  %v1902_v0 = vld [vmem:[%s2902_s13] ss:$0 sm:$0xff] }
0x11c1   :  { %2158 = vmatpush3.bf16.msra.mxu0 %v2189_v12 }
0x1244   :  { %v1615_v46 = vpop.xlane.xlu1 %1614 }
0x1245   :  { %v1618_v47 = vmul.f32 0.03125, %v1615_v46 }
0x1247   :  { %v1620_v48 = vsub.f32 %v1609_v60, %v1618_v47 }
0x1249   :  { %v1622_v49 = vmul.f32 %v1620_v48, %v1620_v48 }
0x124b   :  { %v1626_v50 = vsel %vm187_vm1, %v1622_v49, 0.0 }
0x124c   :  { %1627 = vadd.xlane.f32.xlu1 %v1626_v50  ;;  %v1909_v50 = vld [vmem:[%s2906_s17] ss:$0 sm:$0xff] }
0x12d9   :  { %v1628_v57 = vpop.xlane.xlu1 %1627 }
0x12da   :  { %v1630_v58 = vmul.f32 0.03125, %v1628_v57 }
0x12dc   :  { %v1632_v59 = vadd.f32 1e-05, %v1630_v58 }
0x12de   :  { %2224 = vrsqrt.f32 %v1632_v59 }
0x12e8   :  { %v2225_v63 = vpop.eup %2224 }
0x12e9   :  { %v1636_v5 = vmul.f32 %v2225_v63, %v1620_v48  ;;  %v1908_v48 = vld [vmem:[%s2905_s16] ss:$0 sm:$0xff] }
0x12eb   :  { %v1644_v8 = vmul.f32 %v1896_v62, %v1636_v5 }
0x12ed   :  { %v1652_v9 = vadd.f32 %v1897_v7, %v1644_v8 }
0x12ef   :  { %v1653_v10 = vpack.c.bf16 %v1652_v9, %v1651_v22 }
0x12f1   :  { %2148 = vmatmul.mubr.msk.bf16.vlgmr.msra.gmra.mrb[56].mxu1 %vm187_vm1, %v1653_v10 }
0x13c4   :  { %v1709_v15 = vpop.f32.mrb[56].mxu1 }
0x13c5   :  { %v1710_v16 = vadd.f32 %v1898_v13, %v1709_v15  ;;  %v2149_v20 = vpop.f32.mrb[57].mxu1 }
0x13c6   :  { %v1712_v21 = vpop.f32.mrb[58].mxu1 }
0x13c7   :  { %v1713_v23 = vadd.f32 %v1898_v13, %v1712_v21  ;;  %v2150_v24 = vpop.f32.mrb[59].mxu1  ;;  %v1716_v36 = vmax.f32 %v1710_v16, 0.0 }
0x13c9   :  { %v1717_v26 = vmax.f32 %v1713_v23, 0.0 }
0x13cb   :  { %v1718_v25 = vpack.c.bf16 %v1717_v26, %v1716_v36 }
0x13cd   :  { %2160 = vmatmul.mubr.msk.bf16.vlgmr.msra.gmra.mrb[52].mxu0 %vm1749_vm4, %v1718_v25 }
0x14a0   :  { %v1787_v18 = vpop.f32.mrb[52].mxu0 }
0x14a1   :  { %v1788_v27 = vadd.f32 %v1902_v0, %v1787_v18  ;;  %v2161_v28 = vpop.f32.mrb[53].mxu0 }
0x14a2   :  { %v1790_v29 = vpop.f32.mrb[54].mxu0 }
0x14a3   :  { %v1791_v30 = vadd.f32 %v1902_v0, %v1790_v29  ;;  %v2162_v14 = vpop.f32.mrb[55].mxu0  ;;  %v1794_v1 = vadd.f32 %v1788_v27, %v1651_v22 }
0x14a5   :  { %v1796_v31 = vsel %vm187_vm1, %v1794_v1, 0.0  ;;  %v1795_v32 = vadd.f32 %v1791_v30, %v1652_v9 }
0x14a6   :  { %1797 = vadd.xlane.f32.xlu1 %v1796_v31 }
0x14a7   :  { %v1799_v33 = vsel %vm187_vm1, %v1795_v32, 0.0 }
0x14aa   :  { %1800 = vadd.xlane.f32.xlu1 %v1799_v33 }
0x1533   :  { %v1798_v3 = vpop.xlane.xlu1 %1797 }
0x1534   :  { %v1802_v34 = vmul.f32 0.03125, %v1798_v3 }
0x1536   :  { %v1804_v35 = vsub.f32 %v1794_v1, %v1802_v34 }
0x1537   :  { %v1801_v37 = vpop.xlane.xlu1 %1800 }
0x1538   :  { %v1803_v38 = vmul.f32 0.03125, %v1801_v37  ;;  %v1806_v39 = vmul.f32 %v1804_v35, %v1804_v35 }
0x153a   :  { %v1805_v40 = vsub.f32 %v1795_v32, %v1803_v38  ;;  %v1808_v41 = vsel %vm187_vm1, %v1806_v39, 0.0 }
0x153b   :  { %1809 = vadd.xlane.f32.xlu1 %v1808_v41 }
0x153c   :  { %v1807_v42 = vmul.f32 %v1805_v40, %v1805_v40 }
0x153e   :  { %v1811_v6 = vsel %vm187_vm1, %v1807_v42, 0.0 }
0x153f   :  { %1812 = vadd.xlane.f32.xlu1 %v1811_v6 }
0x15c8   :  { %v1810_v43 = vpop.xlane.xlu1 %1809 }
0x15c9   :  { %v1814_v53 = vmul.f32 0.03125, %v1810_v43 }
0x15cb   :  { %v1816_v44 = vadd.f32 1e-05, %v1814_v53 }
0x15cc   :  { %v1813_v60 = vpop.xlane.xlu1 %1812 }
0x15cd   :  { %2226 = vrsqrt.f32 %v1816_v44  ;;  %v1815_v45 = vmul.f32 0.03125, %v1813_v60 }
0x15cf   :  { %v1817_v46 = vadd.f32 1e-05, %v1815_v45 }
0x15d1   :  { %2228 = vrsqrt.f32 %v1817_v46 }
0x15d7   :  { %v2227_v47 = vpop.eup %2226 }
0x15d8   :  { %v1820_v49 = vmul.f32 %v2227_v47, %v1804_v35 }
0x15da   :  { %v1828_v51 = vmul.f32 %v1908_v48, %v1820_v49 }
0x15db   :  { %v2229_v52 = vpop.eup %2228 }
0x15dc   :  { %v1821_v4 = vmul.f32 %v2229_v52, %v1805_v40  ;;  %v1836_v54 = vadd.f32 %v1909_v50, %v1828_v51 }
0x15de   :  { %v1829_v19 = vmul.f32 %v1908_v48, %v1821_v4  ;;  %1838 = vst.msk [vmem:[#allocation11] sm:$0xff] %vm187_vm1, %v1836_v54 }
0x15e0   :  { %v1837_v55 = vadd.f32 %v1909_v50, %v1829_v19 }
0x15e2   :  { %1839 = vst.msk [vmem:[#allocation11 + $0x8] sm:$0xff] %vm187_vm1, %v1837_v55 }
0x15e3   :  { %2351 = shalt.err (!%p2348_p2)
}
0x15e4   :  { %s2352_s19 = scalar_lea.hbm %s2907_s18, 256 }
0x15e5   :  { %p2353_p3 = scmp.ne.s32.totalorder %s2907_s18, %s2352_s19  ;;  %p2356_p4 = scmp.lt.u32.totalorder %s2352_s19, %s2907_s18 }
0x15e7   :  { %p2358_p5 = pnand %p2356_p4, %p2353_p3 }
0x15e9   :  { %2361 = shalt.err (!%p2358_p5)
}
0x15ea   :  { %s2383_s22 = smov 128   ;;  %s2384_s3 = smov 8  }
0x15eb   :  { %1851 = dma.vmem_to_hbm [thread:$0]  %s1846_s5, 256, %s2907_s18, [#allocation4], %s2383_s22, %s2383_s22, %s2384_s3  }
0x15ec   :  { %2368 = dma.done.wait [#allocation4], 256  }
0x15ed   :  { %2369 = vsyncadd [#allocation4], 4294967040 }
0x15ee   :  { %1855 = vsyncpa [#allocation3], 1 }
0x15ef   :  { %1856 = vsyncpa [#allocation6], 1 }
0x15f0   :  { %1857 = vsyncpa [#allocation9], 1 }
0x15f1   :  { %1858 = vsyncpa [#allocation4], 1 }

</bundles_post_ra>
